<compile_context>
chip_gen: v6e
topology: v6e:2x2x1
jax: 0.10.0
libtpu: 0.0.40
codegen_flags: <defaults>
</compile_context>

<pallas_src>
import functools

import jax
import jax.numpy as jnp
from jax.experimental import pallas as pl
from jax.experimental.pallas import tpu as pltpu

BN_EPS = 1e-5
_TILE_CANDIDATES = (16384, 8192, 4096, 2048, 1024, 512, 256, 128)
_VMEM_TILE_BUDGET = 20 * 1024 * 1024   # double-buffered per-step block budget
_VMEM_LIMIT_BYTES = 48 * 1024 * 1024   # raise scoped VMEM cap (v5e default 16 MiB)


def _round_up(n, m):
    return ((n + m - 1) // m) * m


def _pick_tile(s, rows_per_lane, batch):
    """Largest lane tile whose double-buffered f32 blocks fit the VMEM budget."""
    s128 = _round_up(s, 128)
    fits = [t for t in _TILE_CANDIDATES
            if t <= s128 and rows_per_lane * 4 * 2 * t <= _VMEM_TILE_BUDGET]
    if not fits:
        fits = [128]
    if batch < 2:  # keep >= 2 grid steps (v7x has 2 TCs; double-buffering)
        multi = [t for t in fits if pl.cdiv(s, t) >= 2]
        fits = multi or [fits[-1]]
    for t in fits:                        # prefer an evenly dividing tile
        if s % t == 0:
            return t, s // t
    return fits[0], pl.cdiv(s, fits[0])   # ragged last block handled by Pallas


def _compiler_params():
    return pltpu.CompilerParams(
        dimension_semantics=("parallel", "parallel"),
        vmem_limit_bytes=_VMEM_LIMIT_BYTES)


# ---------------------------------------------------------------------------
# Pallas kernels (all operate on (C, S_tile) blocks: channels in sublanes,
# spatial in lanes)
# ---------------------------------------------------------------------------
def _score_kernel(patch_ref, g_ref, tw_ref, pw_ref, pb_ref, psi_ref, psib_ref,
                  o_ref):
    """Both gates' attention scores in one pass.

    score_g = sigmoid(psi_g . relu(Wtheta_g @ patch + Wphi_g @ g + bphi_g) + b_g)

    patch:(K,T)  g:(Cg,T)  tw:(2I,K)  pw:(2I,Cg)  pb:(2I,1)
    psi:(2,2I) block-diagonal  psib:(2,1)  o:(2,T)
    """
    theta = jnp.dot(tw_ref[...], patch_ref[...],
                    preferred_element_type=jnp.float32)
    phi = jnp.dot(pw_ref[...], g_ref[...],
                  preferred_element_type=jnp.float32) + pb_ref[...]
    f = jnp.maximum(theta + phi, 0.0)                       # (2I, T)
    s = jnp.dot(psi_ref[...], f,
                preferred_element_type=jnp.float32) + psib_ref[...]
    o_ref[...] = jax.nn.sigmoid(s).astype(o_ref.dtype)


def _gate_combine_kernel(x_ref, attn_ref, A1_ref, A2_ref, d_ref, o_ref):
    """out = ReLU(A1 @ (attn1*x) + A2 @ (attn2*x) + d).

    x:(C,T)  attn:(2,T)  A1/A2:(C,C)  d:(C,1)  o:(C,T)
    A_i / d fold: gate-W conv + its BN + half of combine conv + combine BN.
    """
    x = x_ref[...]
    a = attn_ref[...]
    z = jnp.dot(A1_ref[...], x * a[0:1, :],
                preferred_element_type=jnp.float32)
    z = z + jnp.dot(A2_ref[...], x * a[1:2, :],
                    preferred_element_type=jnp.float32)
    z = z + d_ref[...]
    o_ref[...] = jnp.maximum(z, 0.0).astype(o_ref.dtype)


# ---------------------------------------------------------------------------
# Wrappers
# ---------------------------------------------------------------------------
def fused_score(patches, g, tw, pw, pb, psi_mat, psib):
    """Fused dual-gate score.  patches:(B,K,Ss)  g:(B,Cg,Ss)  -> (B,2,Ss)."""
    B, K, Ss = patches.shape
    Cg = g.shape[1]
    I2 = tw.shape[0]
    rows = K + Cg + 2
    tile, n_tiles = _pick_tile(Ss, rows, B)

    cost = pl.CostEstimate(
        flops=2 * B * Ss * I2 * (K + Cg + 2) + 6 * B * Ss * I2,
        transcendentals=2 * B * Ss,
        bytes_accessed=4 * (B * Ss * (K + Cg + 2) + I2 * (K + Cg + 4) + 2))

    return pl.pallas_call(
        _score_kernel,
        out_shape=jax.ShapeDtypeStruct((B, 2, Ss), jnp.float32),
        grid_spec=pltpu.PrefetchScalarGridSpec(
            num_scalar_prefetch=0,
            grid=(B, n_tiles),
            in_specs=[
                pl.BlockSpec((None, K, tile), lambda b, j: (b, 0, j)),
                pl.BlockSpec((None, Cg, tile), lambda b, j: (b, 0, j)),
                pl.BlockSpec((I2, K), lambda b, j: (0, 0)),
                pl.BlockSpec((I2, Cg), lambda b, j: (0, 0)),
                pl.BlockSpec((I2, 1), lambda b, j: (0, 0)),
                pl.BlockSpec((2, I2), lambda b, j: (0, 0)),
                pl.BlockSpec((2, 1), lambda b, j: (0, 0)),
            ],
            out_specs=pl.BlockSpec((None, 2, tile), lambda b, j: (b, 0, j)),
        ),
        compiler_params=_compiler_params(),
        cost_estimate=cost,
    )(patches, g, tw, pw, pb, psi_mat, psib)


def gate_combine(x, attn, A1, A2, d):
    """Fused gating (x2) + combine conv + BN + ReLU.

    x:(B,C,S)  attn:(B,2,S)  -> (B,C,S)."""
    B, C, S = x.shape
    rows = 2 * C + 2
    tile, n_tiles = _pick_tile(S, rows, B)

    cost = pl.CostEstimate(
        flops=4 * B * S * C * C + 5 * B * S * C,
        transcendentals=0,
        bytes_accessed=4 * (B * S * (2 * C + 2) + 2 * C * C + C))

    return pl.pallas_call(
        _gate_combine_kernel,
        out_shape=jax.ShapeDtypeStruct((B, C, S), jnp.float32),
        grid_spec=pltpu.PrefetchScalarGridSpec(
            num_scalar_prefetch=0,
            grid=(B, n_tiles),
            in_specs=[
                pl.BlockSpec((None, C, tile), lambda b, j: (b, 0, j)),
                pl.BlockSpec((None, 2, tile), lambda b, j: (b, 0, j)),
                pl.BlockSpec((C, C), lambda b, j: (0, 0)),
                pl.BlockSpec((C, C), lambda b, j: (0, 0)),
                pl.BlockSpec((C, 1), lambda b, j: (0, 0)),
            ],
            out_specs=pl.BlockSpec((None, C, tile), lambda b, j: (b, 0, j)),
        ),
        compiler_params=_compiler_params(),
        cost_estimate=cost,
    )(x, attn, A1, A2, d)


# ---------------------------------------------------------------------------
# JAX glue: trilinear resize (F.interpolate / F.upsample, align_corners=False)
# and strided-conv patch extraction.
# ---------------------------------------------------------------------------
def _linear_resize_axis(x, axis, out_size):
    in_size = x.shape[axis]
    if in_size == out_size:
        return x
    idx = jnp.arange(out_size, dtype=jnp.float32)
    src = (idx + 0.5) * (in_size / out_size) - 0.5
    src = jnp.clip(src, 0.0, in_size - 1)
    i0 = jnp.floor(src).astype(jnp.int32)
    i1 = jnp.minimum(i0 + 1, in_size - 1)
    w = src - i0.astype(jnp.float32)
    x0 = jnp.take(x, i0, axis=axis)
    x1 = jnp.take(x, i1, axis=axis)
    shp = [1] * x.ndim
    shp[axis] = out_size
    w = w.reshape(shp)
    return x0 * (1.0 - w) + x1 * w


def trilinear_resize(x, out_spatial):
    # x: (B, C, D, H, W)
    for ax, s in zip((2, 3, 4), out_spatial):
        x = _linear_resize_axis(x, ax, s)
    return x


def extract_patches(x, sub):
    """(B,C,D,H,W) -> (B, C*sub^3, Ds*Hs*Ws); row order (c, kd, kh, kw)."""
    B, C, D, H, W = x.shape
    Ds, Hs, Ws = D // sub, H // sub, W // sub
    xp = x.reshape(B, C, Ds, sub, Hs, sub, Ws, sub)
    xp = xp.transpose(0, 1, 3, 5, 7, 2, 4, 6)        # (B,C,kd,kh,kw,Ds,Hs,Ws)
    return xp.reshape(B, C * sub ** 3, Ds * Hs * Ws)


# ---------------------------------------------------------------------------
# Model
# ---------------------------------------------------------------------------
def attention_maps(x_patches, g_flat, params, theta_spatial, in_spatial,
                   g_spatial):
    """Full-resolution attention maps (B, 2, D, H, W) of both gate blocks."""
    B, Cg = g_flat.shape[0], g_flat.shape[1]
    p1, p2 = params["gate1"], params["gate2"]
    inter = p1["phi_w"].shape[0]

    # 1x1 conv commutes with per-channel trilinear interpolation, so resizing
    # g to the theta grid is exactly F.upsample(phi(g), theta.spatial).
    if tuple(g_spatial) != tuple(theta_spatial):
        g_flat = trilinear_resize(
            g_flat.reshape(B, Cg, *g_spatial), theta_spatial).reshape(B, Cg, -1)

    tw = jnp.concatenate([p1["theta_w"], p2["theta_w"]], axis=0)   # (2I, K)
    pw = jnp.concatenate([p1["phi_w"], p2["phi_w"]], axis=0)       # (2I, Cg)
    pb = jnp.concatenate([p1["phi_b"], p2["phi_b"]], axis=0).reshape(-1, 1)
    psib = jnp.stack([p1["psi_b"][0], p2["psi_b"][0]]).reshape(2, 1)
    psi_mat = jnp.zeros((2, 2 * inter), jnp.float32)
    psi_mat = psi_mat.at[0, :inter].set(p1["psi_w"])
    psi_mat = psi_mat.at[1, inter:].set(p2["psi_w"])               # block-diag

    score = fused_score(x_patches, g_flat, tw, pw, pb, psi_mat, psib)
    score = score.reshape(B, 2, *theta_spatial)
    return trilinear_resize(score, in_spatial)                     # (B,2,D,H,W)


def fold_gate_combine(params):
    """Fold W-conv+BN of each gate and the combine conv+BN into A1, A2, d."""
    p1, p2 = params["gate1"], params["gate2"]
    sc, tc = params["combine_bn_scale"], params["combine_bn_shift"]
    Wc, bc = params["combine_w"], params["combine_b"]
    C = Wc.shape[0]

    def fold_gate(p):
        G = p["W_bn_scale"][:, None] * p["W_w"]               # diag(s) W
        c = p["W_bn_scale"] * p["W_b"] + p["W_bn_shift"]
        return G, c

    G1, c1 = fold_gate(p1)
    G2, c2 = fold_gate(p2)
    Wc1, Wc2 = Wc[:, :C], Wc[:, C:]
    A1 = sc[:, None] * (Wc1 @ G1)
    A2 = sc[:, None] * (Wc2 @ G2)
    d = sc * (Wc1 @ c1 + Wc2 @ c2 + bc) + tc
    return A1, A2, d.reshape(C, 1)


def multi_attention_block(x, g, params, sub=2):
    """x: (B, C, D, H, W), g: (B, Cg, Dg, Hg, Wg) — NCDHW like PyTorch."""
    B, C, D, H, W = x.shape
    _, Cg, Dg, Hg, Wg = g.shape
    Ds, Hs, Ws = D // sub, H // sub, W // sub

    patches = extract_patches(x, sub)                         # shared by gates
    g_flat = g.reshape(B, Cg, Dg * Hg * Wg)

    attn = attention_maps(patches, g_flat, params,
                          (Ds, Hs, Ws), (D, H, W), (Dg, Hg, Wg))

    A1, A2, d = fold_gate_combine(params)
    out = gate_combine(x.reshape(B, C, -1), attn.reshape(B, 2, -1), A1, A2, d)
    return out.reshape(B, C, D, H, W), attn


# ---------------------------------------------------------------------------
# Deterministic parameter init (synthetic; mirrors module __init__ shapes)
# ---------------------------------------------------------------------------
def _bn_fold(channels):
    # fresh BN (eval mode): gamma=1, beta=0, running_mean=0, running_var=1
    scale = jnp.full((channels,), 1.0 / jnp.sqrt(1.0 + BN_EPS), jnp.float32)
    shift = jnp.zeros((channels,), jnp.float32)
    return scale, shift


def init_gate_params(key, in_ch, gate_ch, inter_ch, sub):
    ks = jax.random.split(key, 7)
    theta_w = 0.1 * jax.random.normal(
        ks[0], (inter_ch, in_ch, sub, sub, sub), jnp.float32)
    phi_w = 0.1 * jax.random.normal(ks[1], (inter_ch, gate_ch), jnp.float32)
    phi_b = 0.1 * jax.random.normal(ks[2], (inter_ch,), jnp.float32)
    psi_w = 0.1 * jax.random.normal(ks[3], (inter_ch,), jnp.float32)
    psi_b = 0.1 * jax.random.normal(ks[4], (1,), jnp.float32)
    W_w = 0.1 * jax.random.normal(ks[5], (in_ch, in_ch), jnp.float32)
    W_b = 0.1 * jax.random.normal(ks[6], (in_ch,), jnp.float32)
    bn_scale, bn_shift = _bn_fold(in_ch)
    return {
        # (O,C,kd,kh,kw) -> (O, C*sub^3); matches extract_patches row order
        "theta_w": theta_w.reshape(inter_ch, in_ch * sub ** 3),
        "phi_w": phi_w,
        "phi_b": phi_b,
        "psi_w": psi_w,
        "psi_b": psi_b,
        "W_w": W_w,
        "W_b": W_b,
        "W_bn_scale": bn_scale,
        "W_bn_shift": bn_shift,
    }


def init_params(key, in_ch, gate_ch, inter_ch, sub):
    k1, k2, k3, k4 = jax.random.split(key, 4)
    comb_w = 0.1 * jax.random.normal(k3, (in_ch, 2 * in_ch), jnp.float32)
    comb_b = 0.1 * jax.random.normal(k4, (in_ch,), jnp.float32)
    bn_scale, bn_shift = _bn_fold(in_ch)
    return {
        "gate1": init_gate_params(k1, in_ch, gate_ch, inter_ch, sub),
        "gate2": init_gate_params(k2, in_ch, gate_ch, inter_ch, sub),
        "combine_w": comb_w,
        "combine_b": comb_b,
        "combine_bn_scale": bn_scale,
        "combine_bn_shift": bn_shift,
    }


# ---------------------------------------------------------------------------
if __name__ == "__main__":
    key = jax.random.PRNGKey(0)
    B, C_in, C_gate, C_inter = 2, 8, 16, 8
    D = H = W = 16
    sub = 2
    Dg = Hg = Wg = D // sub  # gating signal comes from one level deeper

    k_x, k_g, k_p = jax.random.split(key, 3)
    x = jax.random.normal(k_x, (B, C_in, D, H, W), jnp.float32)       # NCDHW
    g = jax.random.normal(k_g, (B, C_gate, Dg, Hg, Wg), jnp.float32)  # NCDHW
    params = init_params(k_p, C_in, C_gate, C_inter, sub)

    fn = jax.jit(functools.partial(multi_attention_block, sub=sub))
    out, attn = fn(x, g, params)
    jax.block_until_ready((out, attn))

    assert out.shape == (B, C_in, D, H, W)
    assert attn.shape == (B, 2, D, H, W)
    print("KERNEL_OK")
</pallas_src>

<mosaic_0001>
module attributes {stable_mosaic.version = 11 : i64} {
  func.func @_score_kernel(%arg0: i32, %arg1: i32, %arg2: memref<1x64x512xf32, #tpu.memory_space<vmem>>, %arg3: memref<1x16x512xf32, #tpu.memory_space<vmem>>, %arg4: memref<16x64xf32, #tpu.memory_space<vmem>>, %arg5: memref<16x16xf32, #tpu.memory_space<vmem>>, %arg6: memref<16x1xf32, #tpu.memory_space<vmem>>, %arg7: memref<2x16xf32, #tpu.memory_space<vmem>>, %arg8: memref<2x1xf32, #tpu.memory_space<vmem>>, %arg9: memref<1x2x512xf32, #tpu.memory_space<vmem>>) attributes {dimension_semantics = [#tpu.dimension_semantics<parallel>, #tpu.dimension_semantics<parallel>], iteration_bounds = array<i64: 2, 1>, scalar_prefetch = 0 : i64, scratch_operands = 0 : i64, tpu.core_type = #tpu.core_type<tc>, window_params = [{transform_indices = @transform_0, window_bounds = array<i64: 1, 64, 512>}, {transform_indices = @transform_1, window_bounds = array<i64: 1, 16, 512>}, {pipeline_mode = #tpu.pipeline_mode<synchronous>, transform_indices = @transform_2, window_bounds = array<i64: 16, 64>}, {pipeline_mode = #tpu.pipeline_mode<synchronous>, transform_indices = @transform_3, window_bounds = array<i64: 16, 16>}, {pipeline_mode = #tpu.pipeline_mode<synchronous>, transform_indices = @transform_4, window_bounds = array<i64: 16, 1>}, {pipeline_mode = #tpu.pipeline_mode<synchronous>, transform_indices = @transform_5, window_bounds = array<i64: 2, 16>}, {pipeline_mode = #tpu.pipeline_mode<synchronous>, transform_indices = @transform_6, window_bounds = array<i64: 2, 1>}, {transform_indices = @transform_7, window_bounds = array<i64: 1, 2, 512>}]} {
    %c0 = arith.constant 0 : index
    %c0_0 = arith.constant 0 : index
    %0 = vector.load %arg4[%c0, %c0_0] : memref<16x64xf32, #tpu.memory_space<vmem>>, vector<16x64xf32>
    %c0_1 = arith.constant 0 : index
    %c0_2 = arith.constant 0 : index
    %c0_3 = arith.constant 0 : index
    %1 = vector.load %arg2[%c0_1, %c0_2, %c0_3] : memref<1x64x512xf32, #tpu.memory_space<vmem>>, vector<1x64x512xf32>
    %2 = vector.shape_cast %1 : vector<1x64x512xf32> to vector<64x512xf32>
    %cst = arith.constant dense<0.000000e+00> : vector<16x512xf32>
    %3 = tpu.matmul %0, %2, %cst {dimension_numbers = #tpu.dot_dimension_numbers<[1], [0], [0], [1], [0, 0, 1, 1], [], []>} : vector<16x64xf32>, vector<64x512xf32>, vector<16x512xf32> -> vector<16x512xf32>
    %c0_4 = arith.constant 0 : index
    %c0_5 = arith.constant 0 : index
    %4 = vector.load %arg5[%c0_4, %c0_5] : memref<16x16xf32, #tpu.memory_space<vmem>>, vector<16x16xf32>
    %c0_6 = arith.constant 0 : index
    %c0_7 = arith.constant 0 : index
    %c0_8 = arith.constant 0 : index
    %5 = vector.load %arg3[%c0_6, %c0_7, %c0_8] : memref<1x16x512xf32, #tpu.memory_space<vmem>>, vector<1x16x512xf32>
    %6 = vector.shape_cast %5 : vector<1x16x512xf32> to vector<16x512xf32>
    %cst_9 = arith.constant dense<0.000000e+00> : vector<16x512xf32>
    %7 = tpu.matmul %4, %6, %cst_9 {dimension_numbers = #tpu.dot_dimension_numbers<[1], [0], [0], [1], [0, 0, 1, 1], [], []>} : vector<16x16xf32>, vector<16x512xf32>, vector<16x512xf32> -> vector<16x512xf32>
    %c0_10 = arith.constant 0 : index
    %c0_11 = arith.constant 0 : index
    %8 = vector.load %arg6[%c0_10, %c0_11] : memref<16x1xf32, #tpu.memory_space<vmem>>, vector<16x1xf32>
    %9 = vector.broadcast %8 : vector<16x1xf32> to vector<16x512xf32>
    %10 = arith.addf %7, %9 : vector<16x512xf32>
    %11 = arith.addf %3, %10 : vector<16x512xf32>
    %cst_12 = arith.constant 0.000000e+00 : f32
    %12 = vector.broadcast %cst_12 : f32 to vector<16x512xf32>
    %13 = arith.maximumf %11, %12 : vector<16x512xf32>
    %c0_13 = arith.constant 0 : index
    %c0_14 = arith.constant 0 : index
    %14 = vector.load %arg7[%c0_13, %c0_14] : memref<2x16xf32, #tpu.memory_space<vmem>>, vector<2x16xf32>
    %cst_15 = arith.constant dense<0.000000e+00> : vector<2x512xf32>
    %15 = tpu.matmul %14, %13, %cst_15 {dimension_numbers = #tpu.dot_dimension_numbers<[1], [0], [0], [1], [0, 0, 1, 1], [], []>} : vector<2x16xf32>, vector<16x512xf32>, vector<2x512xf32> -> vector<2x512xf32>
    %c0_16 = arith.constant 0 : index
    %c0_17 = arith.constant 0 : index
    %16 = vector.load %arg8[%c0_16, %c0_17] : memref<2x1xf32, #tpu.memory_space<vmem>>, vector<2x1xf32>
    %17 = vector.broadcast %16 : vector<2x1xf32> to vector<2x512xf32>
    %18 = arith.addf %15, %17 : vector<2x512xf32>
    %19 = arith.negf %18 : vector<2x512xf32>
    %20 = math.exp %19 : vector<2x512xf32>
    %cst_18 = arith.constant 1.000000e+00 : f32
    %21 = vector.broadcast %cst_18 : f32 to vector<2x512xf32>
    %22 = arith.addf %21, %20 : vector<2x512xf32>
    %23 = arith.divf %21, %22 : vector<2x512xf32>
    %c0_19 = arith.constant 0 : index
    %c0_20 = arith.constant 0 : index
    %c0_21 = arith.constant 0 : index
    %24 = vector.load %arg9[%c0_19, %c0_20, %c0_21] : memref<1x2x512xf32, #tpu.memory_space<vmem>>, vector<1x2x512xf32>
    %25 = vector.shape_cast %24 : vector<1x2x512xf32> to vector<2x512xf32>
    %26 = vector.shape_cast %23 : vector<2x512xf32> to vector<1x2x512xf32>
    tpu.vector_store %arg9[%c0_19, %c0_20, %c0_21], %26 {strides = array<i32>} : memref<1x2x512xf32, #tpu.memory_space<vmem>>, vector<1x2x512xf32>,
    return
  }
  func.func @transform_0(%arg0: i32, %arg1: i32) -> (i32, i32, i32) {
    %c0_i32 = arith.constant 0 : i32
    %c0_i32_0 = arith.constant 0 : i32
    return %arg0, %c0_i32, %arg1 : i32, i32, i32
  }
  func.func @transform_1(%arg0: i32, %arg1: i32) -> (i32, i32, i32) {
    %c0_i32 = arith.constant 0 : i32
    %c0_i32_0 = arith.constant 0 : i32
    return %arg0, %c0_i32, %arg1 : i32, i32, i32
  }
  func.func @transform_2(%arg0: i32, %arg1: i32) -> (i32, i32) {
    %c0_i32 = arith.constant 0 : i32
    %c0_i32_0 = arith.constant 0 : i32
    %c0_i32_1 = arith.constant 0 : i32
    return %c0_i32, %c0_i32_0 : i32, i32
  }
  func.func @transform_3(%arg0: i32, %arg1: i32) -> (i32, i32) {
    %c0_i32 = arith.constant 0 : i32
    %c0_i32_0 = arith.constant 0 : i32
    %c0_i32_1 = arith.constant 0 : i32
    return %c0_i32, %c0_i32_0 : i32, i32
  }
  func.func @transform_4(%arg0: i32, %arg1: i32) -> (i32, i32) {
    %c0_i32 = arith.constant 0 : i32
    %c0_i32_0 = arith.constant 0 : i32
    %c0_i32_1 = arith.constant 0 : i32
    return %c0_i32, %c0_i32_0 : i32, i32
  }
  func.func @transform_5(%arg0: i32, %arg1: i32) -> (i32, i32) {
    %c0_i32 = arith.constant 0 : i32
    %c0_i32_0 = arith.constant 0 : i32
    %c0_i32_1 = arith.constant 0 : i32
    return %c0_i32, %c0_i32_0 : i32, i32
  }
  func.func @transform_6(%arg0: i32, %arg1: i32) -> (i32, i32) {
    %c0_i32 = arith.constant 0 : i32
    %c0_i32_0 = arith.constant 0 : i32
    %c0_i32_1 = arith.constant 0 : i32
    return %c0_i32, %c0_i32_0 : i32, i32
  }
  func.func @transform_7(%arg0: i32, %arg1: i32) -> (i32, i32, i32) {
    %c0_i32 = arith.constant 0 : i32
    %c0_i32_0 = arith.constant 0 : i32
    return %arg0, %c0_i32, %arg1 : i32, i32, i32
  }
}

module attributes {stable_mosaic.version = 11 : i64} {
  func.func @_gate_combine_kernel(%arg0: i32, %arg1: i32, %arg2: memref<1x8x4096xf32, #tpu.memory_space<vmem>>, %arg3: memref<1x2x4096xf32, #tpu.memory_space<vmem>>, %arg4: memref<8x8xf32, #tpu.memory_space<vmem>>, %arg5: memref<8x8xf32, #tpu.memory_space<vmem>>, %arg6: memref<8x1xf32, #tpu.memory_space<vmem>>, %arg7: memref<1x8x4096xf32, #tpu.memory_space<vmem>>) attributes {dimension_semantics = [#tpu.dimension_semantics<parallel>, #tpu.dimension_semantics<parallel>], iteration_bounds = array<i64: 2, 1>, scalar_prefetch = 0 : i64, scratch_operands = 0 : i64, tpu.core_type = #tpu.core_type<tc>, window_params = [{transform_indices = @transform_0, window_bounds = array<i64: 1, 8, 4096>}, {transform_indices = @transform_1, window_bounds = array<i64: 1, 2, 4096>}, {pipeline_mode = #tpu.pipeline_mode<synchronous>, transform_indices = @transform_2, window_bounds = array<i64: 8, 8>}, {pipeline_mode = #tpu.pipeline_mode<synchronous>, transform_indices = @transform_3, window_bounds = array<i64: 8, 8>}, {pipeline_mode = #tpu.pipeline_mode<synchronous>, transform_indices = @transform_4, window_bounds = array<i64: 8, 1>}, {transform_indices = @transform_5, window_bounds = array<i64: 1, 8, 4096>}]} {
    %c0 = arith.constant 0 : index
    %c0_0 = arith.constant 0 : index
    %c0_1 = arith.constant 0 : index
    %0 = vector.load %arg2[%c0, %c0_0, %c0_1] : memref<1x8x4096xf32, #tpu.memory_space<vmem>>, vector<1x8x4096xf32>
    %1 = vector.shape_cast %0 : vector<1x8x4096xf32> to vector<8x4096xf32>
    %c0_2 = arith.constant 0 : index
    %c0_3 = arith.constant 0 : index
    %c0_4 = arith.constant 0 : index
    %2 = vector.load %arg3[%c0_2, %c0_3, %c0_4] : memref<1x2x4096xf32, #tpu.memory_space<vmem>>, vector<1x2x4096xf32>
    %3 = vector.shape_cast %2 : vector<1x2x4096xf32> to vector<2x4096xf32>
    %c0_5 = arith.constant 0 : index
    %c0_6 = arith.constant 0 : index
    %4 = vector.load %arg4[%c0_5, %c0_6] : memref<8x8xf32, #tpu.memory_space<vmem>>, vector<8x8xf32>
    %5 = vector.extract_strided_slice %3 {offsets = [0, 0], sizes = [1, 4096], strides = [1, 1]} : vector<2x4096xf32> to vector<1x4096xf32>
    %6 = vector.broadcast %5 : vector<1x4096xf32> to vector<8x4096xf32>
    %7 = arith.mulf %1, %6 : vector<8x4096xf32>
    %cst = arith.constant dense<0.000000e+00> : vector<8x4096xf32>
    %8 = tpu.matmul %4, %7, %cst {dimension_numbers = #tpu.dot_dimension_numbers<[1], [0], [0], [1], [0, 0, 1, 1], [], []>} : vector<8x8xf32>, vector<8x4096xf32>, vector<8x4096xf32> -> vector<8x4096xf32>
    %c0_7 = arith.constant 0 : index
    %c0_8 = arith.constant 0 : index
    %9 = vector.load %arg5[%c0_7, %c0_8] : memref<8x8xf32, #tpu.memory_space<vmem>>, vector<8x8xf32>
    %10 = vector.extract_strided_slice %3 {offsets = [1, 0], sizes = [1, 4096], strides = [1, 1]} : vector<2x4096xf32> to vector<1x4096xf32>
    %11 = vector.broadcast %10 : vector<1x4096xf32> to vector<8x4096xf32>
    %12 = arith.mulf %1, %11 : vector<8x4096xf32>
    %cst_9 = arith.constant dense<0.000000e+00> : vector<8x4096xf32>
    %13 = tpu.matmul %9, %12, %cst_9 {dimension_numbers = #tpu.dot_dimension_numbers<[1], [0], [0], [1], [0, 0, 1, 1], [], []>} : vector<8x8xf32>, vector<8x4096xf32>, vector<8x4096xf32> -> vector<8x4096xf32>
    %14 = arith.addf %8, %13 : vector<8x4096xf32>
    %c0_10 = arith.constant 0 : index
    %c0_11 = arith.constant 0 : index
    %15 = vector.load %arg6[%c0_10, %c0_11] : memref<8x1xf32, #tpu.memory_space<vmem>>, vector<8x1xf32>
    %16 = vector.broadcast %15 : vector<8x1xf32> to vector<8x4096xf32>
    %17 = arith.addf %14, %16 : vector<8x4096xf32>
    %cst_12 = arith.constant 0.000000e+00 : f32
    %18 = vector.broadcast %cst_12 : f32 to vector<8x4096xf32>
    %19 = arith.maximumf %17, %18 : vector<8x4096xf32>
    %c0_13 = arith.constant 0 : index
    %c0_14 = arith.constant 0 : index
    %c0_15 = arith.constant 0 : index
    %20 = vector.load %arg7[%c0_13, %c0_14, %c0_15] : memref<1x8x4096xf32, #tpu.memory_space<vmem>>, vector<1x8x4096xf32>
    %21 = vector.shape_cast %20 : vector<1x8x4096xf32> to vector<8x4096xf32>
    %22 = vector.shape_cast %19 : vector<8x4096xf32> to vector<1x8x4096xf32>
    tpu.vector_store %arg7[%c0_13, %c0_14, %c0_15], %22 {strides = array<i32>} : memref<1x8x4096xf32, #tpu.memory_space<vmem>>, vector<1x8x4096xf32>,
    return
  }
  func.func @transform_0(%arg0: i32, %arg1: i32) -> (i32, i32, i32) {
    %c0_i32 = arith.constant 0 : i32
    %c0_i32_0 = arith.constant 0 : i32
    return %arg0, %c0_i32, %arg1 : i32, i32, i32
  }
  func.func @transform_1(%arg0: i32, %arg1: i32) -> (i32, i32, i32) {
    %c0_i32 = arith.constant 0 : i32
    %c0_i32_0 = arith.constant 0 : i32
    return %arg0, %c0_i32, %arg1 : i32, i32, i32
  }
  func.func @transform_2(%arg0: i32, %arg1: i32) -> (i32, i32) {
    %c0_i32 = arith.constant 0 : i32
    %c0_i32_0 = arith.constant 0 : i32
    %c0_i32_1 = arith.constant 0 : i32
    return %c0_i32, %c0_i32_0 : i32, i32
  }
  func.func @transform_3(%arg0: i32, %arg1: i32) -> (i32, i32) {
    %c0_i32 = arith.constant 0 : i32
    %c0_i32_0 = arith.constant 0 : i32
    %c0_i32_1 = arith.constant 0 : i32
    return %c0_i32, %c0_i32_0 : i32, i32
  }
  func.func @transform_4(%arg0: i32, %arg1: i32) -> (i32, i32) {
    %c0_i32 = arith.constant 0 : i32
    %c0_i32_0 = arith.constant 0 : i32
    %c0_i32_1 = arith.constant 0 : i32
    return %c0_i32, %c0_i32_0 : i32, i32
  }
  func.func @transform_5(%arg0: i32, %arg1: i32) -> (i32, i32, i32) {
    %c0_i32 = arith.constant 0 : i32
    %c0_i32_0 = arith.constant 0 : i32
    return %arg0, %c0_i32, %arg1 : i32, i32, i32
  }
}

</mosaic_0001>

<bundles_post_ra>
// kernel: multi_attention_block.2
= control target key start
LH: loop header
LB: loop body
LE: loop exit
PB: predicated region body
PF: predicated region fallthrough
CT: control target
= control target key end

     0   :  { %s1186_s24 = smov 0   ;;  %s1188_s25 = smov 0   ;;  %s1301_s0 = inlined_call_operand.vmem [shape: f32[2,64,512], index: 0, kind: input, shape index: {}]   ;;  %s1302_s1 = inlined_call_operand.vmem [shape: f32[2,16,512], index: 1, kind: input, shape index: {}]   ;;  %s1303_s2 = inlined_call_operand.vmem [shape: f32[16,64], index: 2, kind: input, shape index: {}]   ;;  %s1304_s3 = inlined_call_operand.vmem [shape: f32[16,16], index: 3, kind: input, shape index: {}]   ;;  %s1305_s4 = inlined_call_operand.vmem [shape: f32[16,1], index: 4, kind: input, shape index: {}]   ;;  %s1306_s5 = inlined_call_operand.vmem [shape: f32[2,16], index: 5, kind: input, shape index: {}]   ;;  %s1307_s6 = inlined_call_operand.vmem [shape: f32[2,1], index: 6, kind: input, shape index: {}]   ;;  %s1308_s7 = inlined_call_operand.vmem [shape: f32[2,2,512], index: 7, kind: output, shape index: {}]  }
   0x1   :  { %s1190_s26 = smov 0  }
   0x2 LB: > { %s29_s27 = sadd.s32 1, %s1137_s25  ;;  %p1048_p0 = scmp.ge.s32.totalorder %s1141_s26, 1  ;;  %s1141_s26 = sphi %s1190_s26, %s17_s26   ;;  %s1137_s25 = sphi %s1188_s25, %s1310_s25   ;;  %s1133_s24 = sphi %s1186_s24, %s1309_s24  }
   0x3   : > { %p31_p1 = scmp.ge.s32.totalorder %s29_s27, 2  ;;  %p275_p2 = scmp.lt.s32.totalorder %s1141_s26, 3 }
   0x5   : > { %s1312_s27 = smov (%p31_p1, %s29_s27), 0  ;;  %p276_p3 = pnand %p1048_p0, %p275_p2 }
   0x6   : > { %p325_p4 = scmp.lt.s32.totalorder (!%p276_p3), %s1133_s24, 1 }
   0x7   : > { %279 = sbr.rel (%p276_p3) target bundleno = 484 (0x1e4), region = 48 }
   0xc   : > { %v1143_v0 = vmov 0.0   ;;  %v399_v1 = vld [vmem:[%s1305_s4 + $0x8] sm:$0xff]  ;;  %s1314_s24 = smov (!%p325_p4, %s1133_s24), 1  ;;  %v1144_v2 = vmov 0   ;;  %v388_v11 = vld [vmem:[%s1304_s3] sm:$0xff]  ;;  %vm410_vm0 = vcmask 130048  }
   0xd   : > { %481 = vmatprep.mubr.f32.mxu0 %v1143_v0  ;;  %558 = vmatprep.mubr.f32.mxu1 %v1143_v0  ;;  %s1071_s30 = sshll.u32 %s1314_s24, 8  ;;  %s1072_s8 = sshll.u32 %s1314_s24, 6  ;;  %v389_v32 = vld [vmem:[%s1304_s3 + $0x8] sm:$0xff]  ;;  %v354_v45 = vld [vmem:[%s1303_s2] sm:$0xff]  ;;  %vm571_vm1 = vcmask 523264  }
   0xe   : > { %1101 = vset.pattern.permute.xlu0 %v1144_v2  ;;  %1102 = vset.pattern.permute.xlu1 %v1144_v2  ;;  %s342_s11 = scalar_lea.vmem %s1302_s1, %s1072_s8  ;;  %s1219_s14 = scalar_lea.vmem %s1301_s0, %s1071_s30  ;;  %v398_v46 = vld [vmem:[%s1305_s4] sm:$0xff]  ;;  %v355_v47 = vld [vmem:[%s1303_s2 + $0x8] sm:$0xff] }
   0xf   : > { %407 = vperm.xlu0 %1101, %v399_v1   ;;  %v395_v3 = vld [vmem:[%s342_s11 + $0x28] sm:$0xff]  ;;  %v397_v4 = vld [vmem:[%s342_s11 + $0x38] sm:$0xff]  ;;  %v394_v5 = vld [vmem:[%s342_s11 + $0x20] sm:$0xff]  ;;  %s1073_s10 = sshll.u32 %s1314_s24, 3 }
  0x10   : > { %445 = vmatprep.subr.mxu0 %v395_v3  ;;  %522 = vmatprep.subr.mxu1 %v397_v4  ;;  %v396_v6 = vld [vmem:[%s342_s11 + $0x30] sm:$0xff]  ;;  %v391_v7 = vld [vmem:[%s342_s11 + $0x8] sm:$0xff]  ;;  %v393_v8 = vld [vmem:[%s342_s11 + $0x18] sm:$0xff]  ;;  %s352_s13 = scalar_lea.vmem %s1308_s7, %s1073_s10 }
  0x11   : > { %446 = vmatpush1.msra.mxu0 %v394_v5  ;;  %523 = vmatpush1.msra.mxu1 %v396_v6  ;;  %v390_v9 = vld [vmem:[%s342_s11] sm:$0xff]  ;;  %v392_v10 = vld [vmem:[%s342_s11 + $0x10] sm:$0xff]  ;;  %v385_v12 = vld [vmem:[%s1219_s14 + $0xe8] sm:$0xff] }
  0x12   : > { %447 = vmatprep.subr.mxu0 %v391_v7  ;;  %524 = vmatprep.subr.mxu1 %v393_v8  ;;  %v387_v13 = vld [vmem:[%s1219_s14 + $0xf8] sm:$0xff]  ;;  %v384_v14 = vld [vmem:[%s1219_s14 + $0xe0] sm:$0xff]  ;;  %v386_v15 = vld [vmem:[%s1219_s14 + $0xf0] sm:$0xff] }
  0x13   : > { %448 = vmatpush1.msra.mxu0 %v390_v9  ;;  %525 = vmatpush1.msra.mxu1 %v392_v10  ;;  %v381_v16 = vld [vmem:[%s1219_s14 + $0xc8] sm:$0xff]  ;;  %v383_v17 = vld [vmem:[%s1219_s14 + $0xd8] sm:$0xff]  ;;  %v380_v18 = vld [vmem:[%s1219_s14 + $0xc0] sm:$0xff] }
  0x14   : > { %1055 = vmatmul.mubr.msk.f32.vlgmr.msra.gmra.mxu0 %vm410_vm0, %v388_v11  ;;  %1057 = vmatmul.mubr.msk.f32.vlgmr.msra.gmra.mxu1 %vm410_vm0, %v388_v11  ;;  %v382_v19 = vld [vmem:[%s1219_s14 + $0xd0] sm:$0xff]  ;;  %v377_v20 = vld [vmem:[%s1219_s14 + $0xa8] sm:$0xff]  ;;  %v379_v21 = vld [vmem:[%s1219_s14 + $0xb8] sm:$0xff] }
  0x15   : > { %594 = vmatprep.subr.mxu0 %v385_v12  ;;  %671 = vmatprep.subr.mxu1 %v387_v13  ;;  %v376_v22 = vld [vmem:[%s1219_s14 + $0xa0] sm:$0xff]  ;;  %v378_v23 = vld [vmem:[%s1219_s14 + $0xb0] sm:$0xff]  ;;  %v373_v24 = vld [vmem:[%s1219_s14 + $0x88] sm:$0xff] }
  0x16   : > { %595 = vmatpush1.msra.mxu0 %v384_v14  ;;  %672 = vmatpush1.msra.mxu1 %v386_v15  ;;  %v375_v25 = vld [vmem:[%s1219_s14 + $0x98] sm:$0xff]  ;;  %v372_v26 = vld [vmem:[%s1219_s14 + $0x80] sm:$0xff]  ;;  %v374_v27 = vld [vmem:[%s1219_s14 + $0x90] sm:$0xff] }
  0x17   : > { %596 = vmatprep.subr.mxu0 %v381_v16  ;;  %673 = vmatprep.subr.mxu1 %v383_v17  ;;  %v369_v28 = vld [vmem:[%s1219_s14 + $0x68] sm:$0xff]  ;;  %v371_v29 = vld [vmem:[%s1219_s14 + $0x78] sm:$0xff]  ;;  %v368_v30 = vld [vmem:[%s1219_s14 + $0x60] sm:$0xff] }
  0x18   : > { %597 = vmatpush1.msra.mxu0 %v380_v18  ;;  %674 = vmatpush1.msra.mxu1 %v382_v19  ;;  %v370_v31 = vld [vmem:[%s1219_s14 + $0x70] sm:$0xff]  ;;  %v365_v33 = vld [vmem:[%s1219_s14 + $0x48] sm:$0xff]  ;;  %v367_v34 = vld [vmem:[%s1219_s14 + $0x58] sm:$0xff] }
  0x19   : > { %598 = vmatprep.subr.mxu0 %v377_v20  ;;  %675 = vmatprep.subr.mxu1 %v379_v21  ;;  %v364_v35 = vld [vmem:[%s1219_s14 + $0x40] sm:$0xff]  ;;  %v366_v36 = vld [vmem:[%s1219_s14 + $0x50] sm:$0xff]  ;;  %v361_v37 = vld [vmem:[%s1219_s14 + $0x28] sm:$0xff] }
  0x1a   : > { %599 = vmatpush1.msra.mxu0 %v376_v22  ;;  %676 = vmatpush1.msra.mxu1 %v378_v23  ;;  %v363_v38 = vld [vmem:[%s1219_s14 + $0x38] sm:$0xff]  ;;  %v360_v39 = vld [vmem:[%s1219_s14 + $0x20] sm:$0xff]  ;;  %v362_v40 = vld [vmem:[%s1219_s14 + $0x30] sm:$0xff] }
  0x1b   : > { %600 = vmatprep.subr.mxu0 %v373_v24  ;;  %677 = vmatprep.subr.mxu1 %v375_v25  ;;  %v357_v41 = vld [vmem:[%s1219_s14 + $0x8] sm:$0xff]  ;;  %v359_v42 = vld [vmem:[%s1219_s14 + $0x18] sm:$0xff]  ;;  %v356_v43 = vld [vmem:[%s1219_s14] sm:$0xff] }
  0x1c   : > { %601 = vmatpush1.msra.mxu0 %v372_v26  ;;  %678 = vmatpush1.msra.mxu1 %v374_v27  ;;  %v358_v44 = vld [vmem:[%s1219_s14 + $0x10] sm:$0xff]  ;;  %v741_v48 = vld [vmem:[%s1307_s6] sm:$0x3] }
  0x1d   : > { %602 = vmatprep.subr.mxu0 %v369_v28  ;;  %679 = vmatprep.subr.mxu1 %v371_v29  ;;  %v740_v27 = vld [vmem:[%s1306_s5] sm:$0x3] }
  0x1e   : > { %487 = vmatprep.mubr.f32.mxu0 %v1143_v0  ;;  %564 = vmatprep.mubr.f32.mxu1 %v1143_v0 }
  0x1f   : > { %603 = vmatpush1.msra.mxu0 %v368_v30  ;;  %680 = vmatpush1.msra.mxu1 %v370_v31 }
  0x20   : > { %1056 = vmatmul.mubr.msk.f32.gmra.mxu0 %vm410_vm0, %v389_v32  ;;  %1058 = vmatmul.mubr.msk.f32.gmra.mxu1 %vm410_vm0, %v389_v32 }
  0x21   : > { %604 = vmatprep.subr.mxu0 %v365_v33  ;;  %681 = vmatprep.subr.mxu1 %v367_v34 }
  0x22   : > { %605 = vmatpush1.msra.mxu0 %v364_v35  ;;  %682 = vmatpush1.msra.mxu1 %v366_v36 }
  0x23   : > { %606 = vmatprep.subr.mxu0 %v361_v37  ;;  %683 = vmatprep.subr.mxu1 %v363_v38 }
  0x24   : > { %607 = vmatpush1.msra.mxu0 %v360_v39  ;;  %684 = vmatpush1.msra.mxu1 %v362_v40 }
  0x25   : > { %608 = vmatprep.subr.mxu0 %v357_v41  ;;  %685 = vmatprep.subr.mxu1 %v359_v42 }
  0x26   : > { %609 = vmatpush1.msra.mxu0 %v356_v43  ;;  %642 = vmatprep.mubr.f32.mxu0 %v1143_v0 }
  0x27   : > { %686 = vmatpush1.msra.mxu1 %v358_v44  ;;  %719 = vmatprep.mubr.f32.mxu1 %v1143_v0 }
  0x28   : > { %1059 = vmatmul.mubr.msk.f32.vlgmr.msra.gmra.mxu0 %vm571_vm1, %v354_v45  ;;  %1061 = vmatmul.mubr.msk.f32.vlgmr.msra.gmra.mxu1 %vm571_vm1, %v354_v45 }
  0x29   : > { %648 = vmatprep.mubr.f32.mxu0 %v1143_v0  ;;  %725 = vmatprep.mubr.f32.mxu1 %v1143_v0 }
  0x2a   : > { %402 = vperm.xlu0 %1101, %v398_v46   ;;  %744 = vperm.xlu1 %1102, %v741_v48  }
  0x2c   : > { %1060 = vmatmul.mubr.msk.f32.gmra.mxu0 %vm571_vm1, %v355_v47  ;;  %1062 = vmatmul.mubr.msk.f32.gmra.mxu1 %vm571_vm1, %v355_v47 }
  0x2d   : > { %814 = vmatprep.mubr.f32.mxu0 %v1143_v0  ;;  %885 = vmatprep.mubr.f32.mxu1 %v1143_v0 }
  0x8a   : > { %v408_v55 = vpop.permute.xlu0 %407 }
  0xa5   : > { %v403_v60 = vpop.permute.xlu0 %402  ;;  %v745_v28 = vpop.permute.xlu1 %744 }
  0xd4   : > { %v483_v49 = vpop.f32.mrf.mxu0  ;;  %v560_v50 = vpop.f32.mrf.mxu1 }
  0xd5   : > { %v484_v7 = vadd.f32 %v483_v49, %v403_v60  ;;  %v561_v8 = vadd.f32 %v560_v50, %v403_v60  ;;  %v1145_v49 = vmov 1983009808  }
  0xd6   : > { %v485_v51 = vpop.f32.mrf.mxu0  ;;  %v562_v52 = vpop.f32.mrf.mxu1  ;;  %v923_v50 = vunpack.c.l.s4 %v1145_v49 }
  0xd7   : > { %v486_v3 = vadd.f32 %v485_v51, %v403_v60  ;;  %v563_v4 = vadd.f32 %v562_v52, %v403_v60  ;;  %v925_v51 = vlaneseq }
  0xd8   : > { %v924_v52 = vunpack.c.0.s8 %v923_v50 }
  0xe0   : > { %v489_v53 = vpop.f32.mrf.mxu0  ;;  %v566_v54 = vpop.f32.mrf.mxu1 }
  0xe1   : > { %v490_v63 = vadd.f32 %v489_v53, %v408_v55  ;;  %v567_v0 = vadd.f32 %v566_v54, %v408_v55  ;;  %v926_v53 = vshrl.u32 %v925_v51, 7 }
  0xe2   : > { %v491_v56 = vpop.f32.mrf.mxu0  ;;  %v568_v57 = vpop.f32.mrf.mxu1 }
  0xe3   : > { %v492_v5 = vadd.f32 %v491_v56, %v408_v55  ;;  %v569_v6 = vadd.f32 %v568_v57, %v408_v55  ;;  %v927_v56 = vsub.s32 %v924_v52, %v926_v53 }
  0xe8   : > { %v644_v58 = vpop.f32.mrf.mxu0  ;;  %v721_v59 = vpop.f32.mrf.mxu1 }
  0xe9   : > { %v645_v17 = vadd.f32 %v644_v58, %v484_v7  ;;  %v722_v18 = vadd.f32 %v721_v59, %v561_v8 }
  0xea   : > { %v646_v61 = vpop.f32.mrf.mxu0  ;;  %v723_v62 = vpop.f32.mrf.mxu1 }
  0xeb   : > { %v647_v13 = vadd.f32 %v646_v61, %v486_v3  ;;  %v724_v14 = vadd.f32 %v723_v62, %v563_v4  ;;  %v732_v25 = vmax.f32 %v645_v17, 0.0  ;;  %v734_v26 = vmax.f32 %v722_v18, 0.0 }
  0xec   : > { %v650_v1 = vpop.f32.mrf.mxu0  ;;  %v727_v2 = vpop.f32.mrf.mxu1 }
  0xed   : > { %v651_v9 = vadd.f32 %v650_v1, %v490_v63  ;;  %v728_v10 = vadd.f32 %v727_v2, %v567_v0  ;;  %v733_v23 = vmax.f32 %v647_v13, 0.0  ;;  %v735_v24 = vmax.f32 %v724_v14, 0.0 }
  0xee   : > { %v652_v11 = vpop.f32.mrf.mxu0  ;;  %v729_v12 = vpop.f32.mrf.mxu1 }
  0xef   : > { %v653_v15 = vadd.f32 %v652_v11, %v492_v5  ;;  %v730_v16 = vadd.f32 %v729_v12, %v569_v6  ;;  %v736_v21 = vmax.f32 %v651_v9, 0.0  ;;  %v738_v22 = vmax.f32 %v728_v10, 0.0 }
  0xf1   : > { %v737_v19 = vmax.f32 %v653_v15, 0.0  ;;  %v739_v20 = vmax.f32 %v730_v16, 0.0 }
  0xf3   : > { %778 = vmatprep.subr.mxu0 %v737_v19  ;;  %849 = vmatprep.subr.mxu1 %v739_v20 }
  0xf4   : > { %779 = vmatpush1.msra.mxu0 %v736_v21  ;;  %850 = vmatpush1.msra.mxu1 %v738_v22 }
  0xf5   : > { %780 = vmatprep.subr.mxu0 %v733_v23  ;;  %851 = vmatprep.subr.mxu1 %v735_v24 }
  0xf6   : > { %781 = vmatpush1.msra.mxu0 %v732_v25  ;;  %852 = vmatpush1.msra.mxu1 %v734_v26 }
  0xf7   : > { %1063 = vmatmul.mubr.msk.f32.vlgmr.msra.gmra.mxu0 %vm410_vm0, %v740_v27  ;;  %1064 = vmatmul.mubr.msk.f32.vlgmr.msra.gmra.mxu1 %vm410_vm0, %v740_v27 }
 0x1b7   : > { %v816_v29 = vpop.f32.mrf.mxu0  ;;  %v887_v30 = vpop.f32.mrf.mxu1 }
 0x1b8   : > { %v817_v31 = vadd.f32 %v816_v29, %v745_v28  ;;  %v888_v32 = vadd.f32 %v887_v30, %v745_v28 }
 0x1b9   : > { %v818_v33 = vpop.f32.mrf.mxu0  ;;  %v889_v34 = vpop.f32.mrf.mxu1 }
 0x1ba   : > { %v1065_v35 = vmul.f32 -1.442695, %v817_v31  ;;  %v1067_v36 = vmul.f32 -1.442695, %v888_v32  ;;  %v819_v37 = vadd.f32 %v818_v33, %v745_v28  ;;  %v890_v38 = vadd.f32 %v889_v34, %v745_v28 }
 0x1bc   : > { %1103 = vpow2.f32 %v1065_v35  ;;  %v1066_v39 = vmul.f32 -1.442695, %v819_v37  ;;  %v1068_v40 = vmul.f32 -1.442695, %v890_v38 }
 0x1bd   : > { %1105 = vpow2.f32 %v1067_v36 }
 0x1be   : > { %1107 = vpow2.f32 %v1066_v39 }
 0x1bf   : > { %1109 = vpow2.f32 %v1068_v40 }
 0x1c9   : > { %v1104_v41 = vpop.eup %1103 }
 0x1ca   : > { %v1106_v42 = vpop.eup %1105  ;;  %v904_v43 = vadd.f32 1.0, %v1104_v41 }
 0x1cb   : > { %v1108_v44 = vpop.eup %1107  ;;  %v906_v45 = vadd.f32 1.0, %v1106_v42 }
 0x1cc   : > { %v1110_v46 = vpop.eup %1109  ;;  %1111 = vrcp.f32 %v904_v43  ;;  %v905_v47 = vadd.f32 1.0, %v1108_v44 }
 0x1cd   : > { %1113 = vrcp.f32 %v906_v45  ;;  %v907_v48 = vadd.f32 1.0, %v1110_v46 }
 0x1ce   : > { %1115 = vrcp.f32 %v905_v47 }
 0x1cf   : > { %1117 = vrcp.f32 %v907_v48 }
 0x1d9   : > { %v1112_v54 = vpop.eup %1111 }
 0x1da   : > { %v1114_v55 = vpop.eup %1113 }
 0x1db   : > { %v1116_v57 = vpop.eup %1115 }
 0x1dc   : > { %v1118_v58 = vpop.eup %1117  ;;  %v920_v59 = vcombine.low %v1112_v54, %v1116_v57 }
 0x1dd   : > { %v921_v60 = vcombine.low %v1114_v55, %v1118_v58 }
 0x1de   : > { %v928_v61 = vrot.slane %v920_v59, %v927_v56 }
 0x1df   : > { %v935_v62 = vrot.slane %v921_v60, %v927_v56 }
 0x1e1   : > { %v936_v63 = vcombine.low %v928_v61, %v935_v62 }
 0x1e3   : > { %938 = vst [vmem:[%s352_s13] sm:$0xff] %v936_v63 }
 0x1e4 PF: > { %s17_s26 = sadd.s32 1, %s1141_s26   ;;  %s1309_s24 = smov %s1137_s25 }
 0x1e5   : > { %p14_p5 = scmp.ge.s32.totalorder %s17_s26, 4   ;;  %s1310_s25 = smov %s1312_s27 }
 0x1e7   :  { %16 = sbr.rel (!%p14_p5) target bundleno = 2 (0x2), region = 81 }

// kernel: multi_attention_block.3
= control target key start
LH: loop header
LB: loop body
LE: loop exit
PB: predicated region body
PF: predicated region fallthrough
CT: control target
= control target key end

     0   :  { %s3607_s18 = smov 0   ;;  %s3609_s19 = smov 0   ;;  %s4280_s0 = inlined_call_operand.vmem [shape: f32[2,8,4096], index: 0, kind: input, shape index: {}]   ;;  %s4281_s1 = inlined_call_operand.vmem [shape: f32[2,2,4096], index: 1, kind: input, shape index: {}]   ;;  %s4282_s2 = inlined_call_operand.vmem [shape: f32[8,8], index: 2, kind: input, shape index: {}]   ;;  %s4283_s3 = inlined_call_operand.vmem [shape: f32[8,8], index: 3, kind: input, shape index: {}]   ;;  %s4284_s4 = inlined_call_operand.vmem [shape: f32[8,1], index: 4, kind: input, shape index: {}]   ;;  %s4285_s5 = inlined_call_operand.vmem [shape: f32[2,8,4096], index: 5, kind: output, shape index: {}]  }
   0x1   :  { %s3611_s20 = smov 0  }
   0x2 LB: > { %s27_s21 = sadd.s32 1, %s3569_s19  ;;  %p3480_p0 = scmp.ge.s32.totalorder %s3573_s20, 1  ;;  %s3573_s20 = sphi %s3611_s20, %s15_s20   ;;  %s3569_s19 = sphi %s3609_s19, %s4287_s19   ;;  %s3565_s18 = sphi %s3607_s18, %s4286_s18  }
   0x3   : > { %p29_p1 = scmp.ge.s32.totalorder %s27_s21, 2  ;;  %p225_p2 = scmp.lt.s32.totalorder %s3573_s20, 3 }
   0x5   : > { %s4289_s21 = smov (%p29_p1, %s27_s21), 0  ;;  %p226_p3 = pnand %p3480_p0, %p225_p2 }
   0x6   : > { %p271_p4 = scmp.lt.s32.totalorder (!%p226_p3), %s3565_s18, 1 }
   0x7   : > { %229 = sbr.rel (%p226_p3) target bundleno = 290 (0x122), region = 40 }
   0xc   : > { %v349_v0 = vlaneseq  ;;  %v3575_v1 = vmov 0.0   ;;  %v3269_v2 = vld [vmem:[%s4284_s4] sm:$0xff]  ;;  %s4291_s18 = smov (!%p271_p4, %s3565_s18), 1  ;;  %v3576_v4 = vmov 0   ;;  %vm990_vm0 = vcmask 64512  }
   0xd   : > { %1058 = vmatprep.mubr.f32.mxu0 %v3575_v1  ;;  %1129 = vmatprep.mubr.f32.mxu1 %v3575_v1  ;;  %s3521_s24 = sshll.u32 %s4291_s18, 8  ;;  %s3522_s25 = sshll.u32 %s4291_s18, 6  ;;  %v3703_v43 = vld [vmem:[%s4283_s3] sm:$0xff] }
   0xe   : > { %v350_v3 = vshrl.u32 %v349_v0, 7  ;;  %3550 = vset.pattern.permute.xlu0 %v3576_v4  ;;  %s3647_s28 = scalar_lea.vmem %s4280_s0, %s3521_s24  ;;  %s3652_s6 = scalar_lea.vmem %s4281_s1, %s3522_s25 }
   0xf   : > { %3272 = vperm.xlu0 %3550, %v3269_v2   ;;  %v332_v13 = vld [vmem:[%s3652_s6] sm:$0xff]  ;;  %v301_v18 = vld [vmem:[%s3647_s28 + $0x8] sm:$0xff]  ;;  %v303_v19 = vld [vmem:[%s3647_s28 + $0x18] sm:$0xff]  ;;  %s4185_s13 = scalar_lea.vmem %s4285_s5, %s3521_s24 }
  0x10   : > { %v3634_v5 = vsub.s32 0, %v350_v3  ;;  %v3636_v6 = vsub.s32 2, %v350_v3  ;;  %v3638_v7 = vsub.s32 1, %v350_v3  ;;  %v3640_v8 = vsub.s32 3, %v350_v3  ;;  %v300_v28 = vld [vmem:[%s3647_s28] sm:$0xff]  ;;  %v3679_v29 = vld [vmem:[%s3647_s28 + $0x10] sm:$0xff] }
  0x11   : > { %v3654_v9 = vsub.s32 6, %v350_v3  ;;  %v3656_v10 = vsub.s32 7, %v350_v3  ;;  %v3658_v11 = vsub.s32 4, %v350_v3  ;;  %v3660_v12 = vsub.s32 5, %v350_v3  ;;  %v3685_v33 = vld [vmem:[%s3652_s6 + $0x8] sm:$0xff]  ;;  %v3693_v38 = vld [vmem:[%s3652_s6 + $0x10] sm:$0xff] }
  0x12   : > { %v356_v14 = vrot.slane %v332_v13, %v3636_v6  ;;  %v677_v15 = vrot.slane %v332_v13, %v3640_v8  ;;  %v352_v20 = vrot.slane %v332_v13, %v3634_v5  ;;  %v673_v21 = vrot.slane %v332_v13, %v3638_v7  ;;  %v3712_v47 = vld [vmem:[%s3647_s28 + $0x28] sm:$0xff]  ;;  %v3715_v48 = vld [vmem:[%s3647_s28 + $0x38] sm:$0xff]  ;;  %v3718_v49 = vld [vmem:[%s3647_s28 + $0x20] sm:$0xff] }
  0x13   : > { %v364_v16 = vrot.slane %v332_v13, %v3654_v9  ;;  %v685_v17 = vrot.slane %v332_v13, %v3656_v10  ;;  %v360_v22 = vrot.slane %v332_v13, %v3658_v11  ;;  %v681_v23 = vrot.slane %v332_v13, %v3660_v12  ;;  %v3734_v56 = vld [vmem:[%s3647_s28 + $0x30] sm:$0xff]  ;;  %v3737_v57 = vld [vmem:[%s3647_s28 + $0x48] sm:$0xff]  ;;  %v3740_v58 = vld [vmem:[%s3647_s28 + $0x58] sm:$0xff] }
  0x14   : > { %v516_v24 = vrot.slane %v356_v14, %v3634_v5  ;;  %v837_v25 = vrot.slane %v677_v15, %v3638_v7  ;;  %v512_v30 = vrot.slane %v352_v20, %v3634_v5  ;;  %v833_v31 = vrot.slane %v673_v21, %v3638_v7  ;;  %v3748_v62 = vld [vmem:[%s3652_s6 + $0x18] sm:$0xff]  ;;  %v3759_v15 = vld [vmem:[%s3647_s28 + $0x40] sm:$0xff] }
  0x15   : > { %v524_v26 = vrot.slane %v364_v16, %v3634_v5  ;;  %v845_v27 = vrot.slane %v685_v17, %v3638_v7  ;;  %v841_v32 = vrot.slane %v681_v23, %v3638_v7  ;;  %v3690_v37 = vrot.slane %v360_v22, %v3634_v5  ;;  %v3773_v22 = vld [vmem:[%s3647_s28 + $0x68] sm:$0xff]  ;;  %v3776_v23 = vld [vmem:[%s3647_s28 + $0x78] sm:$0xff] }
  0x16   : > { %v3687_v34 = vmul.f32 %v516_v24, %v301_v18  ;;  %v959_v35 = vmul.f32 %v837_v25, %v301_v18  ;;  %v3697_v40 = vmul.f32 %v512_v30, %v300_v28  ;;  %v958_v41 = vmul.f32 %v833_v31, %v300_v28  ;;  %v3765_v18 = vld [vmem:[%s3647_s28 + $0x50] sm:$0xff]  ;;  %v3793_v31 = vld [vmem:[%s3647_s28 + $0x60] sm:$0xff] }
  0x17   : > { %v961_v36 = vmul.f32 %v845_v27, %v303_v19  ;;  %v3695_v39 = vmul.f32 %v524_v26, %v303_v19  ;;  %v960_v42 = vmul.f32 %v841_v32, %v3679_v29  ;;  %v693_v44 = vrot.slane %v3685_v33, %v3640_v8  ;;  %v3783_v26 = vld [vmem:[%s3652_s6 + $0x20] sm:$0xff]  ;;  %v3796_v32 = vld [vmem:[%s3647_s28 + $0x70] sm:$0xff] }
  0x18   : > { %1024 = vmatprep.subr.mxu0 %v959_v35  ;;  %v701_v45 = vrot.slane %v3685_v33, %v3656_v10  ;;  %v689_v46 = vrot.slane %v3685_v33, %v3638_v7  ;;  %v697_v50 = vrot.slane %v3685_v33, %v3660_v12  ;;  %v709_v51 = vrot.slane %v3693_v38, %v3640_v8 }
  0x19   : > { %1095 = vmatprep.subr.mxu1 %v961_v36  ;;  %1025 = vmatpush1.msra.mxu0 %v958_v41  ;;  %v717_v52 = vrot.slane %v3693_v38, %v3656_v10  ;;  %v853_v53 = vrot.slane %v693_v44, %v3638_v7  ;;  %v705_v3 = vrot.slane %v3693_v38, %v3638_v7 }
  0x1a   : > { %1096 = vmatpush1.msra.mxu1 %v960_v42  ;;  %3487 = vmatmul.mubr.msk.f32.vlgmr.msra.gmra.mxu0 %vm990_vm0, %v3703_v43  ;;  %v861_v54 = vrot.slane %v701_v45, %v3638_v7  ;;  %v849_v55 = vrot.slane %v689_v46, %v3638_v7  ;;  %v857_v59 = vrot.slane %v697_v50, %v3638_v7  ;;  %v3807_v46 = vld [vmem:[%s3652_s6 + $0x28] sm:$0xff] }
  0x1b   : > { %3488 = vmatmul.mubr.msk.f32.vlgmr.msra.gmra.mxu1 %vm990_vm0, %v3703_v43  ;;  %1200 = vmatprep.mubr.f32.mxu0 %v3575_v1  ;;  %v869_v60 = vrot.slane %v709_v51, %v3638_v7  ;;  %v877_v61 = vrot.slane %v717_v52, %v3638_v7  ;;  %v963_v63 = vmul.f32 %v853_v53, %v3712_v47  ;;  %v3813_v52 = vld [vmem:[%s3647_s28 + $0x88] sm:$0xff] }
  0x1c   : > { %1271 = vmatprep.mubr.f32.mxu1 %v3575_v1  ;;  %v965_v0 = vmul.f32 %v861_v54, %v3715_v48  ;;  %v962_v2 = vmul.f32 %v849_v55, %v3718_v49  ;;  %v964_v4 = vmul.f32 %v857_v59, %v3734_v56  ;;  %v713_v16 = vrot.slane %v3693_v38, %v3660_v12  ;;  %v3823_v55 = vld [vmem:[%s3647_s28 + $0x98] sm:$0xff] }
  0x1d   : > { %v967_v13 = vmul.f32 %v869_v60, %v3737_v57  ;;  %v969_v14 = vmul.f32 %v877_v61, %v3740_v58  ;;  %1166 = vmatprep.subr.mxu0 %v963_v63  ;;  %v865_v17 = vrot.slane %v705_v3, %v3638_v7  ;;  %v725_v19 = vrot.slane %v3748_v62, %v3640_v8  ;;  %v3831_v63 = vld [vmem:[%s3647_s28 + $0x80] sm:$0xff] }
  0x1e   : > { %1237 = vmatprep.subr.mxu1 %v965_v0  ;;  %v733_v20 = vrot.slane %v3748_v62, %v3656_v10  ;;  %1167 = vmatpush1.msra.mxu0 %v962_v2  ;;  %v873_v21 = vrot.slane %v713_v16, %v3638_v7  ;;  %v721_v24 = vrot.slane %v3748_v62, %v3638_v7  ;;  %v3834_v0 = vld [vmem:[%s3647_s28 + $0x90] sm:$0xff]  ;;  %v3844_v16 = vld [vmem:[%s3647_s28 + $0xa8] sm:$0xff] }
  0x1f   : > { %1238 = vmatpush1.msra.mxu1 %v964_v4  ;;  %v729_v25 = vrot.slane %v3748_v62, %v3660_v12  ;;  %3489 = vmatmul.mubr.msk.f32.vlgmr.msra.gmra.mxu0 %vm990_vm0, %v3703_v43  ;;  %v966_v27 = vmul.f32 %v865_v17, %v3759_v15  ;;  %v885_v28 = vrot.slane %v725_v19, %v3638_v7  ;;  %v3847_v17 = vld [vmem:[%s3647_s28 + $0xb8] sm:$0xff] }
  0x20   : > { %3490 = vmatmul.mubr.msk.f32.vlgmr.msra.gmra.mxu1 %vm990_vm0, %v3703_v43  ;;  %v893_v30 = vrot.slane %v733_v20, %v3638_v7  ;;  %1308 = vmatprep.subr.mxu0 %v967_v13  ;;  %v968_v35 = vmul.f32 %v873_v21, %v3765_v18  ;;  %v881_v36 = vrot.slane %v721_v24, %v3638_v7  ;;  %v3855_v24 = vld [vmem:[%s3652_s6 + $0x30] sm:$0xff] }
  0x21   : > { %1379 = vmatprep.subr.mxu1 %v969_v14  ;;  %v889_v41 = vrot.slane %v729_v25, %v3638_v7  ;;  %1309 = vmatpush1.msra.mxu0 %v966_v27  ;;  %v971_v42 = vmul.f32 %v885_v28, %v3773_v22  ;;  %v741_v45 = vrot.slane %v3783_v26, %v3640_v8 }
  0x22   : > { %1342 = vmatprep.mubr.f32.mxu0 %v3575_v1  ;;  %v973_v44 = vmul.f32 %v893_v30, %v3776_v23  ;;  %1380 = vmatpush1.msra.mxu1 %v968_v35  ;;  %v970_v50 = vmul.f32 %v881_v36, %v3793_v31  ;;  %v749_v53 = vrot.slane %v3783_v26, %v3656_v10  ;;  %v3868_v36 = vld [vmem:[%s3647_s28 + $0xa0] sm:$0xff] }
  0x23   : > { %1413 = vmatprep.mubr.f32.mxu1 %v3575_v1  ;;  %v972_v51 = vmul.f32 %v889_v41, %v3796_v32  ;;  %3491 = vmatmul.mubr.msk.f32.vlgmr.msra.gmra.mxu0 %vm990_vm0, %v3703_v43  ;;  %v901_v54 = vrot.slane %v741_v45, %v3638_v7  ;;  %v737_v59 = vrot.slane %v3783_v26, %v3638_v7 }
  0x24   : > { %3492 = vmatmul.mubr.msk.f32.vlgmr.msra.gmra.mxu1 %vm990_vm0, %v3703_v43  ;;  %v745_v60 = vrot.slane %v3783_v26, %v3660_v12  ;;  %1450 = vmatprep.subr.mxu0 %v971_v42  ;;  %v909_v61 = vrot.slane %v749_v53, %v3638_v7  ;;  %v757_v2 = vrot.slane %v3807_v46, %v3640_v8  ;;  %v3884_v53 = vld [vmem:[%s3647_s28 + $0xc8] sm:$0xff] }
  0x25   : > { %1521 = vmatprep.subr.mxu1 %v973_v44  ;;  %v765_v3 = vrot.slane %v3807_v46, %v3656_v10  ;;  %1451 = vmatpush1.msra.mxu0 %v970_v50  ;;  %v975_v4 = vmul.f32 %v901_v54, %v3813_v52  ;;  %v897_v13 = vrot.slane %v737_v59, %v3638_v7  ;;  %v3874_v44 = vld [vmem:[%s3647_s28 + $0xb0] sm:$0xff]  ;;  %v3887_v54 = vld [vmem:[%s3647_s28 + $0xd8] sm:$0xff] }
  0x26   : > { %1522 = vmatpush1.msra.mxu1 %v972_v51  ;;  %v905_v14 = vrot.slane %v745_v60, %v3638_v7  ;;  %1484 = vmatprep.mubr.f32.mxu0 %v3575_v1  ;;  %v977_v19 = vmul.f32 %v909_v61, %v3823_v55  ;;  %v917_v20 = vrot.slane %v757_v2, %v3638_v7  ;;  %v3894_v61 = vld [vmem:[%s3652_s6 + $0x38] sm:$0xff] }
  0x27   : > { %1555 = vmatprep.mubr.f32.mxu1 %v3575_v1  ;;  %v925_v21 = vrot.slane %v765_v3, %v3638_v7  ;;  %3493 = vmatmul.mubr.msk.f32.vlgmr.msra.gmra.mxu0 %vm990_vm0, %v3703_v43  ;;  %v974_v25 = vmul.f32 %v897_v13, %v3831_v63  ;;  %v753_v28 = vrot.slane %v3807_v46, %v3638_v7  ;;  %v3904_v13 = vld [vmem:[%s3647_s28 + $0xc0] sm:$0xff] }
  0x28   : > { %3494 = vmatmul.mubr.msk.f32.vlgmr.msra.gmra.mxu1 %vm990_vm0, %v3703_v43  ;;  %v976_v27 = vmul.f32 %v905_v14, %v3834_v0  ;;  %1592 = vmatprep.subr.mxu0 %v975_v4  ;;  %v979_v30 = vmul.f32 %v917_v20, %v3844_v16  ;;  %v761_v41 = vrot.slane %v3807_v46, %v3660_v12  ;;  %v3907_v14 = vld [vmem:[%s3647_s28 + $0xd0] sm:$0xff] }
  0x29   : > { %1663 = vmatprep.subr.mxu1 %v977_v19  ;;  %v981_v35 = vmul.f32 %v925_v21, %v3847_v17  ;;  %1593 = vmatpush1.msra.mxu0 %v974_v25  ;;  %v913_v42 = vrot.slane %v753_v28, %v3638_v7  ;;  %v773_v45 = vrot.slane %v3855_v24, %v3640_v8 }
  0x2a   : > { %1664 = vmatpush1.msra.mxu1 %v976_v27  ;;  %v781_v50 = vrot.slane %v3855_v24, %v3656_v10  ;;  %1626 = vmatprep.mubr.f32.mxu0 %v3575_v1  ;;  %v921_v51 = vrot.slane %v761_v41, %v3638_v7  ;;  %v769_v59 = vrot.slane %v3855_v24, %v3638_v7  ;;  %v3921_v41 = vld [vmem:[%s3647_s28 + $0xe8] sm:$0xff] }
  0x2b   : > { %1697 = vmatprep.mubr.f32.mxu1 %v3575_v1  ;;  %v777_v60 = vrot.slane %v3855_v24, %v3660_v12  ;;  %3495 = vmatmul.mubr.msk.f32.vlgmr.msra.gmra.mxu0 %vm990_vm0, %v3703_v43  ;;  %v978_v2 = vmul.f32 %v913_v42, %v3868_v36  ;;  %v933_v3 = vrot.slane %v773_v45, %v3638_v7  ;;  %v3931_v45 = vld [vmem:[%s3647_s28 + $0xf8] sm:$0xff] }
  0x2c   : > { %3496 = vmatmul.mubr.msk.f32.vlgmr.msra.gmra.mxu1 %vm990_vm0, %v3703_v43  ;;  %v941_v4 = vrot.slane %v781_v50, %v3638_v7  ;;  %1734 = vmatprep.subr.mxu0 %v979_v30  ;;  %v980_v19 = vmul.f32 %v921_v51, %v3874_v44  ;;  %v929_v20 = vrot.slane %v769_v59, %v3638_v7  ;;  %v3939_v59 = vld [vmem:[%s3647_s28 + $0xe0] sm:$0xff] }
  0x2d   : > { %1805 = vmatprep.subr.mxu1 %v981_v35  ;;  %v937_v21 = vrot.slane %v777_v60, %v3638_v7  ;;  %1735 = vmatpush1.msra.mxu0 %v978_v2  ;;  %v983_v25 = vmul.f32 %v933_v3, %v3884_v53  ;;  %v789_v28 = vrot.slane %v3894_v61, %v3640_v8  ;;  %v3942_v60 = vld [vmem:[%s3647_s28 + $0xf0] sm:$0xff] }
  0x2e   : > { %1768 = vmatprep.mubr.f32.mxu0 %v3575_v1  ;;  %v985_v27 = vmul.f32 %v941_v4, %v3887_v54  ;;  %1806 = vmatpush1.msra.mxu1 %v980_v19  ;;  %v982_v30 = vmul.f32 %v929_v20, %v3904_v13  ;;  %v797_v42 = vrot.slane %v3894_v61, %v3656_v10 }
  0x2f   : > { %1839 = vmatprep.mubr.f32.mxu1 %v3575_v1  ;;  %v984_v35 = vmul.f32 %v937_v21, %v3907_v14  ;;  %3497 = vmatmul.mubr.msk.f32.vlgmr.msra.gmra.mxu0 %vm990_vm0, %v3703_v43  ;;  %v949_v8 = vrot.slane %v789_v28, %v3638_v7  ;;  %v785_v50 = vrot.slane %v3894_v61, %v3638_v7 }
  0x30   : > { %3498 = vmatmul.mubr.msk.f32.vlgmr.msra.gmra.mxu1 %vm990_vm0, %v3703_v43  ;;  %v793_v51 = vrot.slane %v3894_v61, %v3660_v12  ;;  %1876 = vmatprep.subr.mxu0 %v983_v25  ;;  %v957_v10 = vrot.slane %v797_v42, %v3638_v7  ;;  %v372_v2 = vrot.slane %v3685_v33, %v3636_v6 }
  0x31   : > { %1947 = vmatprep.subr.mxu1 %v985_v27  ;;  %v380_v3 = vrot.slane %v3685_v33, %v3654_v9  ;;  %1877 = vmatpush1.msra.mxu0 %v982_v30  ;;  %v987_v4 = vmul.f32 %v949_v8, %v3921_v41  ;;  %v945_v12 = vrot.slane %v785_v50, %v3638_v7 }
  0x32   : > { %1948 = vmatpush1.msra.mxu1 %v984_v35  ;;  %v953_v19 = vrot.slane %v793_v51, %v3638_v7  ;;  %1910 = vmatprep.mubr.f32.mxu0 %v3575_v1  ;;  %v989_v20 = vmul.f32 %v957_v10, %v3931_v45  ;;  %v532_v21 = vrot.slane %v372_v2, %v3634_v5 }
  0x33   : > { %1981 = vmatprep.mubr.f32.mxu1 %v3575_v1  ;;  %v540_v25 = vrot.slane %v380_v3, %v3634_v5  ;;  %3499 = vmatmul.mubr.msk.f32.vlgmr.msra.gmra.mxu0 %vm990_vm0, %v3703_v43  ;;  %v986_v27 = vmul.f32 %v945_v12, %v3939_v59  ;;  %v368_v28 = vrot.slane %v3685_v33, %v3634_v5 }
  0x34   : > { %3500 = vmatmul.mubr.msk.f32.vlgmr.msra.gmra.mxu1 %vm990_vm0, %v3703_v43  ;;  %v988_v7 = vmul.f32 %v953_v19, %v3942_v60  ;;  %v639_v30 = vmul.f32 %v3690_v37, %v3679_v29  ;;  %2018 = vmatprep.subr.mxu0 %v987_v4  ;;  %v642_v35 = vmul.f32 %v532_v21, %v3712_v47 }
  0x35   : > { %2089 = vmatprep.subr.mxu1 %v989_v20  ;;  %v376_v42 = vrot.slane %v3685_v33, %v3658_v11  ;;  %2019 = vmatpush1.msra.mxu0 %v986_v27  ;;  %v528_v8 = vrot.slane %v368_v28, %v3634_v5  ;;  %v388_v50 = vrot.slane %v3693_v38, %v3636_v6 }
  0x36   : > { %2090 = vmatpush1.msra.mxu1 %v988_v7  ;;  %v396_v51 = vrot.slane %v3693_v38, %v3654_v9  ;;  %2052 = vmatprep.mubr.f32.mxu0 %v3575_v1  ;;  %v384_v37 = vrot.slane %v3693_v38, %v3634_v5  ;;  %v392_v33 = vrot.slane %v3693_v38, %v3658_v11  ;;  %v3993_v38 = vld [vmem:[%s4282_s2] sm:$0xff] }
  0x37   : > { %2123 = vmatprep.mubr.f32.mxu1 %v3575_v1  ;;  %v536_v29 = vrot.slane %v376_v42, %v3634_v5  ;;  %3501 = vmatmul.mubr.msk.f32.vlgmr.msra.gmra.mxu0 %vm990_vm0, %v3703_v43  ;;  %v644_v47 = vmul.f32 %v540_v25, %v3715_v48  ;;  %v548_v10 = vrot.slane %v388_v50, %v3634_v5 }
  0x38   : > { %3502 = vmatmul.mubr.msk.f32.vlgmr.msra.gmra.mxu1 %vm990_vm0, %v3703_v43  ;;  %v556_v2 = vrot.slane %v396_v51, %v3634_v5  ;;  %2163 = vmatprep.subr.mxu0 %v3687_v34  ;;  %v641_v3 = vmul.f32 %v528_v8, %v3718_v49  ;;  %v544_v43 = vrot.slane %v384_v37, %v3634_v5 }
  0x39   : > { %2234 = vmatprep.subr.mxu1 %v3695_v39  ;;  %v643_v4 = vmul.f32 %v536_v29, %v3734_v56  ;;  %2164 = vmatpush1.msra.mxu0 %v3697_v40  ;;  %v646_v48 = vmul.f32 %v548_v10, %v3737_v57  ;;  %v552_v34 = vrot.slane %v392_v33, %v3634_v5 }
  0x3a   : > { %2235 = vmatpush1.msra.mxu1 %v639_v30  ;;  %v404_v39 = vrot.slane %v3748_v62, %v3636_v6  ;;  %2197 = vmatprep.mubr.f32.mxu0 %v3575_v1  ;;  %v648_v49 = vmul.f32 %v556_v2, %v3740_v58  ;;  %v645_v56 = vmul.f32 %v544_v43, %v3759_v15 }
  0x3b   : > { %2268 = vmatprep.mubr.f32.mxu1 %v3575_v1  ;;  %v412_v12 = vrot.slane %v3748_v62, %v3654_v9  ;;  %3503 = vmatmul.mubr.msk.f32.vlgmr.msra.gmra.mxu0 %vm990_vm0, %v3993_v38  ;;  %v400_v57 = vrot.slane %v3748_v62, %v3634_v5  ;;  %v408_v19 = vrot.slane %v3748_v62, %v3658_v11 }
  0x3c   : > { %3504 = vmatmul.mubr.msk.f32.vlgmr.msra.gmra.mxu1 %vm990_vm0, %v3993_v38  ;;  %v564_v40 = vrot.slane %v404_v39, %v3634_v5  ;;  %2305 = vmatprep.subr.mxu0 %v642_v35  ;;  %v420_v15 = vrot.slane %v3783_v26, %v3636_v6  ;;  %v428_v20 = vrot.slane %v3783_v26, %v3654_v9 }
  0x3d   : > { %2376 = vmatprep.subr.mxu1 %v644_v47  ;;  %v572_v58 = vrot.slane %v412_v12, %v3634_v5  ;;  %2306 = vmatpush1.msra.mxu0 %v641_v3  ;;  %v647_v21 = vmul.f32 %v552_v34, %v3765_v18  ;;  %v560_v25 = vrot.slane %v400_v57, %v3634_v5 }
  0x3e   : > { %2377 = vmatpush1.msra.mxu1 %v643_v4  ;;  %v568_v27 = vrot.slane %v408_v19, %v3634_v5  ;;  %2339 = vmatprep.mubr.f32.mxu0 %v3575_v1  ;;  %v650_v62 = vmul.f32 %v564_v40, %v3773_v22  ;;  %v580_v28 = vrot.slane %v420_v15, %v3634_v5 }
  0x3f   : > { %2410 = vmatprep.mubr.f32.mxu1 %v3575_v1  ;;  %v652_v7 = vmul.f32 %v572_v58, %v3776_v23  ;;  %3505 = vmatmul.mubr.msk.f32.vlgmr.msra.gmra.mxu0 %vm990_vm0, %v3993_v38  ;;  %v649_v18 = vmul.f32 %v560_v25, %v3793_v31  ;;  %v588_v30 = vrot.slane %v428_v20, %v3634_v5 }
  0x40   : > { %3506 = vmatmul.mubr.msk.f32.vlgmr.msra.gmra.mxu1 %vm990_vm0, %v3993_v38  ;;  %v416_v35 = vrot.slane %v3783_v26, %v3634_v5  ;;  %2447 = vmatprep.subr.mxu0 %v646_v48  ;;  %v651_v22 = vmul.f32 %v568_v27, %v3796_v32  ;;  %v654_v23 = vmul.f32 %v580_v28, %v3813_v52 }
  0x41   : > { %2518 = vmatprep.subr.mxu1 %v648_v49  ;;  %v424_v42 = vrot.slane %v3783_v26, %v3658_v11  ;;  %2448 = vmatpush1.msra.mxu0 %v645_v56  ;;  %v436_v31 = vrot.slane %v3807_v46, %v3636_v6  ;;  %v444_v50 = vrot.slane %v3807_v46, %v3654_v9 }
  0x42   : > { %2519 = vmatpush1.msra.mxu1 %v647_v21  ;;  %v576_v8 = vrot.slane %v416_v35, %v3634_v5  ;;  %2481 = vmatprep.mubr.f32.mxu0 %v3575_v1  ;;  %v432_v52 = vrot.slane %v3807_v46, %v3634_v5  ;;  %v440_v26 = vrot.slane %v3807_v46, %v3658_v11 }
  0x43   : > { %2552 = vmatprep.mubr.f32.mxu1 %v3575_v1  ;;  %v584_v32 = vrot.slane %v424_v42, %v3634_v5  ;;  %3507 = vmatmul.mubr.msk.f32.vlgmr.msra.gmra.mxu0 %vm990_vm0, %v3993_v38  ;;  %v656_v51 = vmul.f32 %v588_v30, %v3823_v55  ;;  %v596_v29 = vrot.slane %v436_v31, %v3634_v5 }
  0x44   : > { %3508 = vmatmul.mubr.msk.f32.vlgmr.msra.gmra.mxu1 %vm990_vm0, %v3993_v38  ;;  %v604_v37 = vrot.slane %v444_v50, %v3634_v5  ;;  %2589 = vmatprep.subr.mxu0 %v650_v62  ;;  %v653_v33 = vmul.f32 %v576_v8, %v3831_v63  ;;  %v592_v46 = vrot.slane %v432_v52, %v3634_v5 }
  0x45   : > { %2660 = vmatprep.subr.mxu1 %v652_v7  ;;  %v655_v47 = vmul.f32 %v584_v32, %v3834_v0  ;;  %2590 = vmatpush1.msra.mxu0 %v649_v18  ;;  %v658_v10 = vmul.f32 %v596_v29, %v3844_v16  ;;  %v600_v2 = vrot.slane %v440_v26, %v3634_v5 }
  0x46   : > { %2661 = vmatpush1.msra.mxu1 %v651_v22  ;;  %v452_v55 = vrot.slane %v3855_v24, %v3636_v6  ;;  %2623 = vmatprep.mubr.f32.mxu0 %v3575_v1  ;;  %v660_v3 = vmul.f32 %v604_v37, %v3847_v17  ;;  %v657_v63 = vmul.f32 %v592_v46, %v3868_v36 }
  0x47   : > { %2694 = vmatprep.mubr.f32.mxu1 %v3575_v1  ;;  %v460_v0 = vrot.slane %v3855_v24, %v3654_v9  ;;  %3509 = vmatmul.mubr.msk.f32.vlgmr.msra.gmra.mxu0 %vm990_vm0, %v3993_v38  ;;  %v448_v4 = vrot.slane %v3855_v24, %v3634_v5  ;;  %v456_v43 = vrot.slane %v3855_v24, %v3658_v11 }
  0x48   : > { %3510 = vmatmul.mubr.msk.f32.vlgmr.msra.gmra.mxu1 %vm990_vm0, %v3993_v38  ;;  %v612_v16 = vrot.slane %v452_v55, %v3634_v5  ;;  %2731 = vmatprep.subr.mxu0 %v654_v23  ;;  %v468_v36 = vrot.slane %v3894_v61, %v3636_v6  ;;  %v476_v48 = vrot.slane %v3894_v61, %v3654_v9 }
  0x49   : > { %2802 = vmatprep.subr.mxu1 %v656_v51  ;;  %v620_v17 = vrot.slane %v460_v0, %v3634_v5  ;;  %2732 = vmatpush1.msra.mxu0 %v653_v33  ;;  %v659_v34 = vmul.f32 %v600_v2, %v3874_v44  ;;  %v608_v39 = vrot.slane %v448_v4, %v3634_v5 }
  0x4a   : > { %2803 = vmatpush1.msra.mxu1 %v655_v47  ;;  %v616_v49 = vrot.slane %v456_v43, %v3634_v5  ;;  %2765 = vmatprep.mubr.f32.mxu0 %v3575_v1  ;;  %v662_v6 = vmul.f32 %v612_v16, %v3884_v53  ;;  %v464_v24 = vrot.slane %v3894_v61, %v3634_v5 }
  0x4b   : > { %2836 = vmatprep.mubr.f32.mxu1 %v3575_v1  ;;  %3511 = vmatmul.mubr.msk.f32.vlgmr.msra.gmra.mxu0 %vm990_vm0, %v3993_v38  ;;  %v664_v9 = vmul.f32 %v620_v17, %v3887_v54  ;;  %v628_v44 = vrot.slane %v468_v36, %v3634_v5  ;;  %v636_v56 = vrot.slane %v476_v48, %v3634_v5 }
  0x4c   : > { %3512 = vmatmul.mubr.msk.f32.vlgmr.msra.gmra.mxu1 %vm990_vm0, %v3993_v38  ;;  %2873 = vmatprep.subr.mxu0 %v658_v10  ;;  %v472_v12 = vrot.slane %v3894_v61, %v3658_v11  ;;  %v661_v40 = vmul.f32 %v608_v39, %v3904_v13  ;;  %v663_v53 = vmul.f32 %v616_v49, %v3907_v14 }
  0x4d   : > { %2944 = vmatprep.subr.mxu1 %v660_v3  ;;  %2874 = vmatpush1.msra.mxu0 %v657_v63  ;;  %v624_v54 = vrot.slane %v464_v24, %v3634_v5  ;;  %v666_v11 = vmul.f32 %v628_v44, %v3921_v41  ;;  %v668_v61 = vmul.f32 %v636_v56, %v3931_v45 }
  0x4e   : > { %2945 = vmatpush1.msra.mxu1 %v659_v34  ;;  %2907 = vmatprep.mubr.f32.mxu0 %v3575_v1  ;;  %v632_v57 = vrot.slane %v472_v12, %v3634_v5 }
  0x4f   : > { %2978 = vmatprep.mubr.f32.mxu1 %v3575_v1  ;;  %3513 = vmatmul.mubr.msk.f32.vlgmr.msra.gmra.mxu0 %vm990_vm0, %v3993_v38  ;;  %v665_v13 = vmul.f32 %v624_v54, %v3939_v59 }
  0x50   : > { %3514 = vmatmul.mubr.msk.f32.vlgmr.msra.gmra.mxu1 %vm990_vm0, %v3993_v38  ;;  %3015 = vmatprep.subr.mxu0 %v662_v6  ;;  %v667_v14 = vmul.f32 %v632_v57, %v3942_v60 }
  0x51   : > { %3086 = vmatprep.subr.mxu1 %v664_v9  ;;  %3016 = vmatpush1.msra.mxu0 %v661_v40 }
  0x52   : > { %3087 = vmatpush1.msra.mxu1 %v663_v53  ;;  %3049 = vmatprep.mubr.f32.mxu0 %v3575_v1 }
  0x53   : > { %3120 = vmatprep.mubr.f32.mxu1 %v3575_v1  ;;  %3515 = vmatmul.mubr.msk.f32.vlgmr.msra.gmra.mxu0 %vm990_vm0, %v3993_v38 }
  0x54   : > { %3516 = vmatmul.mubr.msk.f32.vlgmr.msra.gmra.mxu1 %vm990_vm0, %v3993_v38  ;;  %3157 = vmatprep.subr.mxu0 %v666_v11 }
  0x55   : > { %3228 = vmatprep.subr.mxu1 %v668_v61  ;;  %3158 = vmatpush1.msra.mxu0 %v665_v13 }
  0x56   : > { %3229 = vmatpush1.msra.mxu1 %v667_v14  ;;  %3191 = vmatprep.mubr.f32.mxu0 %v3575_v1 }
  0x57   : > { %3262 = vmatprep.mubr.f32.mxu1 %v3575_v1  ;;  %3517 = vmatmul.mubr.msk.f32.vlgmr.msra.gmra.mxu0 %vm990_vm0, %v3993_v38 }
  0x58   : > { %3518 = vmatmul.mubr.msk.f32.vlgmr.msra.gmra.mxu1 %vm990_vm0, %v3993_v38 }
  0x8a   : > { %v4176_v33 = vpop.permute.xlu0 %3272 }
  0xda   : > { %v1060_v5 = vpop.f32.mrf.mxu0 }
  0xdb   : > { %v1131_v41 = vpop.f32.mrf.mxu1 }
  0xdc   : > { %v1062_v45 = vpop.f32.mrf.mxu0 }
  0xdd   : > { %v1133_v59 = vpop.f32.mrf.mxu1 }
  0xdf   : > { %v1202_v60 = vpop.f32.mrf.mxu0 }
  0xe0   : > { %v1273_v19 = vpop.f32.mrf.mxu1 }
  0xe1   : > { %v1204_v58 = vpop.f32.mrf.mxu0 }
  0xe2   : > { %v1275_v15 = vpop.f32.mrf.mxu1 }
  0xe3   : > { %v1344_v20 = vpop.f32.mrf.mxu0 }
  0xe4   : > { %v1415_v21 = vpop.f32.mrf.mxu1 }
  0xe5   : > { %v4132_v25 = vpop.f32.mrf.mxu0 }
  0xe6   : > { %v4134_v27 = vpop.f32.mrf.mxu1 }
  0xe7   : > { %v4136_v1 = vpop.f32.mrf.mxu0 }
  0xe8   : > { %v4138_v62 = vpop.f32.mrf.mxu1 }
  0xe9   : > { %v4140_v7 = vpop.f32.mrf.mxu0 }
  0xea   : > { %v4142_v38 = vpop.f32.mrf.mxu1 }
  0xeb   : > { %v4144_v28 = vpop.f32.mrf.mxu0 }
  0xec   : > { %v4146_v18 = vpop.f32.mrf.mxu1 }
  0xed   : > { %v4148_v30 = vpop.f32.mrf.mxu0 }
  0xee   : > { %v4150_v35 = vpop.f32.mrf.mxu1 }
  0xef   : > { %v4152_v22 = vpop.f32.mrf.mxu0 }
  0xf0   : > { %v4154_v23 = vpop.f32.mrf.mxu1 }
  0xf1   : > { %v4156_v42 = vpop.f32.mrf.mxu0 }
  0xf2   : > { %v4158_v8 = vpop.f32.mrf.mxu1 }
  0xf3   : > { %v4160_v31 = vpop.f32.mrf.mxu0 }
  0xf4   : > { %v4162_v50 = vpop.f32.mrf.mxu1 }
  0xf5   : > { %v4164_v32 = vpop.f32.mrf.mxu0 }
  0xf6   : > { %v4166_v52 = vpop.f32.mrf.mxu1 }
  0xf7   : > { %v4168_v26 = vpop.f32.mrf.mxu0 }
  0xf8   : > { %v4170_v51 = vpop.f32.mrf.mxu1 }
  0xf9   : > { %v4172_v29 = vpop.f32.mrf.mxu0 }
  0xfa   : > { %v4174_v37 = vpop.f32.mrf.mxu1 }
  0xfb   : > { %v2199_v47 = vpop.f32.mrf.mxu0 }
  0xfc   : > { %v2270_v46 = vpop.f32.mrf.mxu1  ;;  %v2200_v10 = vadd.f32 %v2199_v47, %v1060_v5 }
  0xfd   : > { %v2271_v2 = vadd.f32 %v2270_v46, %v1131_v41  ;;  %v2201_v55 = vpop.f32.mrf.mxu0 }
  0xfe   : > { %v2272_v3 = vpop.f32.mrf.mxu1  ;;  %v3275_v63 = vadd.f32 %v4176_v33, %v2200_v10  ;;  %v2202_v16 = vadd.f32 %v2201_v55, %v1062_v45 }
  0xff   : > { %v3277_v0 = vadd.f32 %v4176_v33, %v2271_v2  ;;  %v2273_v4 = vadd.f32 %v2272_v3, %v1133_v59  ;;  %v2341_v43 = vpop.f32.mrf.mxu0 }
 0x100   : > { %v2412_v17 = vpop.f32.mrf.mxu1  ;;  %v3307_v36 = vmax.f32 %v3275_v63, 0.0  ;;  %v3276_v34 = vadd.f32 %v4176_v33, %v2202_v16  ;;  %v2342_v49 = vadd.f32 %v2341_v43, %v1202_v60 }
 0x101   : > { %v3309_v48 = vmax.f32 %v3277_v0, 0.0  ;;  %v3278_v39 = vadd.f32 %v4176_v33, %v2273_v4  ;;  %v2413_v6 = vadd.f32 %v2412_v17, %v1273_v19  ;;  %v2343_v9 = vpop.f32.mrf.mxu0 }
 0x102   : > { %v2414_v24 = vpop.f32.mrf.mxu1  ;;  %3339 = vst [vmem:[%s4185_s13] sm:$0xff] %v3307_v36  ;;  %v3308_v44 = vmax.f32 %v3276_v34, 0.0  ;;  %v2344_v12 = vadd.f32 %v2343_v9, %v1204_v58  ;;  %v3279_v53 = vadd.f32 %v4176_v33, %v2342_v49 }
 0x103   : > { %3341 = vst [vmem:[%s4185_s13 + $0x10] sm:$0xff] %v3309_v48  ;;  %v3310_v56 = vmax.f32 %v3278_v39, 0.0  ;;  %v2415_v40 = vadd.f32 %v2414_v24, %v1275_v15  ;;  %v3281_v54 = vadd.f32 %v4176_v33, %v2413_v6  ;;  %v2483_v57 = vpop.f32.mrf.mxu0 }
 0x104   : > { %v2554_v11 = vpop.f32.mrf.mxu1  ;;  %3340 = vst [vmem:[%s4185_s13 + $0x8] sm:$0xff] %v3308_v44  ;;  %v3280_v61 = vadd.f32 %v4176_v33, %v2344_v12  ;;  %v2484_v14 = vadd.f32 %v2483_v57, %v1344_v20  ;;  %v3311_v41 = vmax.f32 %v3279_v53, 0.0 }
 0x105   : > { %3342 = vst [vmem:[%s4185_s13 + $0x18] sm:$0xff] %v3310_v56  ;;  %v3282_v13 = vadd.f32 %v4176_v33, %v2415_v40  ;;  %v2555_v5 = vadd.f32 %v2554_v11, %v1415_v21  ;;  %v3313_v45 = vmax.f32 %v3281_v54, 0.0  ;;  %v2485_v59 = vpop.f32.mrf.mxu0 }
 0x106   : > { %v2556_v60 = vpop.f32.mrf.mxu1  ;;  %v3312_v19 = vmax.f32 %v3280_v61, 0.0  ;;  %v3283_v15 = vadd.f32 %v4176_v33, %v2484_v14  ;;  %3343 = vst [vmem:[%s4185_s13 + $0x20] sm:$0xff] %v3311_v41  ;;  %v2486_v46 = vadd.f32 %v2485_v59, %v4132_v25 }
 0x107   : > { %v3314_v58 = vmax.f32 %v3282_v13, 0.0  ;;  %v3285_v47 = vadd.f32 %v4176_v33, %v2555_v5  ;;  %3345 = vst [vmem:[%s4185_s13 + $0x30] sm:$0xff] %v3313_v45  ;;  %v2557_v20 = vadd.f32 %v2556_v60, %v4134_v27  ;;  %v2625_v21 = vpop.f32.mrf.mxu0 }
 0x108   : > { %v2696_v10 = vpop.f32.mrf.mxu1  ;;  %3344 = vst [vmem:[%s4185_s13 + $0x28] sm:$0xff] %v3312_v19  ;;  %v3315_v2 = vmax.f32 %v3283_v15, 0.0  ;;  %v2626_v3 = vadd.f32 %v2625_v21, %v4136_v1  ;;  %v3284_v0 = vadd.f32 %v4176_v33, %v2486_v46 }
 0x109   : > { %3346 = vst [vmem:[%s4185_s13 + $0x38] sm:$0xff] %v3314_v58  ;;  %v3317_v55 = vmax.f32 %v3285_v47, 0.0  ;;  %v2697_v63 = vadd.f32 %v2696_v10, %v4138_v62  ;;  %v3286_v16 = vadd.f32 %v4176_v33, %v2557_v20  ;;  %v2627_v4 = vpop.f32.mrf.mxu0 }
 0x10a   : > { %v2698_v43 = vpop.f32.mrf.mxu1  ;;  %3347 = vst [vmem:[%s4185_s13 + $0x40] sm:$0xff] %v3315_v2  ;;  %v3287_v25 = vadd.f32 %v4176_v33, %v2626_v3  ;;  %v2628_v17 = vadd.f32 %v2627_v4, %v4140_v7  ;;  %v3316_v62 = vmax.f32 %v3284_v0, 0.0 }
 0x10b   : > { %3349 = vst [vmem:[%s4185_s13 + $0x50] sm:$0xff] %v3317_v55  ;;  %v3289_v27 = vadd.f32 %v4176_v33, %v2697_v63  ;;  %v2699_v1 = vadd.f32 %v2698_v43, %v4142_v38  ;;  %v3318_v36 = vmax.f32 %v3286_v16, 0.0  ;;  %v2767_v48 = vpop.f32.mrf.mxu0 }
 0x10c   : > { %v2838_v34 = vpop.f32.mrf.mxu1  ;;  %v3319_v39 = vmax.f32 %v3287_v25, 0.0  ;;  %v3288_v6 = vadd.f32 %v4176_v33, %v2628_v17  ;;  %3348 = vst [vmem:[%s4185_s13 + $0x48] sm:$0xff] %v3316_v62  ;;  %v2768_v7 = vadd.f32 %v2767_v48, %v4144_v28 }
 0x10d   : > { %v3321_v49 = vmax.f32 %v3289_v27, 0.0  ;;  %v3290_v9 = vadd.f32 %v4176_v33, %v2699_v1  ;;  %3350 = vst [vmem:[%s4185_s13 + $0x58] sm:$0xff] %v3318_v36  ;;  %v2839_v24 = vadd.f32 %v2838_v34, %v4146_v18  ;;  %v2769_v38 = vpop.f32.mrf.mxu0 }
 0x10e   : > { %v2840_v44 = vpop.f32.mrf.mxu1  ;;  %3351 = vst [vmem:[%s4185_s13 + $0x60] sm:$0xff] %v3319_v39  ;;  %v3320_v56 = vmax.f32 %v3288_v6, 0.0  ;;  %v2770_v40 = vadd.f32 %v2769_v38, %v4148_v30  ;;  %v3291_v54 = vadd.f32 %v4176_v33, %v2768_v7 }
 0x10f   : > { %3353 = vst [vmem:[%s4185_s13 + $0x70] sm:$0xff] %v3321_v49  ;;  %v3322_v12 = vmax.f32 %v3290_v9, 0.0  ;;  %v2841_v53 = vadd.f32 %v2840_v44, %v4150_v35  ;;  %v3293_v57 = vadd.f32 %v4176_v33, %v2839_v24  ;;  %v2909_v11 = vpop.f32.mrf.mxu0 }
 0x110   : > { %v2980_v61 = vpop.f32.mrf.mxu1  ;;  %3352 = vst [vmem:[%s4185_s13 + $0x68] sm:$0xff] %v3320_v56  ;;  %v3292_v28 = vadd.f32 %v4176_v33, %v2770_v40  ;;  %v2910_v13 = vadd.f32 %v2909_v11, %v4152_v22  ;;  %v3323_v35 = vmax.f32 %v3291_v54, 0.0 }
 0x111   : > { %3354 = vst [vmem:[%s4185_s13 + $0x78] sm:$0xff] %v3322_v12  ;;  %v3294_v18 = vadd.f32 %v4176_v33, %v2841_v53  ;;  %v2981_v30 = vadd.f32 %v2980_v61, %v4154_v23  ;;  %v3325_v14 = vmax.f32 %v3293_v57, 0.0  ;;  %v2911_v5 = vpop.f32.mrf.mxu0 }
 0x112   : > { %v2982_v41 = vpop.f32.mrf.mxu1  ;;  %v3324_v45 = vmax.f32 %v3292_v28, 0.0  ;;  %v3295_v60 = vadd.f32 %v4176_v33, %v2910_v13  ;;  %3355 = vst [vmem:[%s4185_s13 + $0x80] sm:$0xff] %v3323_v35  ;;  %v2912_v22 = vadd.f32 %v2911_v5, %v4156_v42 }
 0x113   : > { %v3326_v59 = vmax.f32 %v3294_v18, 0.0  ;;  %v3297_v19 = vadd.f32 %v4176_v33, %v2981_v30  ;;  %3357 = vst [vmem:[%s4185_s13 + $0x90] sm:$0xff] %v3325_v14  ;;  %v2983_v58 = vadd.f32 %v2982_v41, %v4158_v8  ;;  %v3051_v23 = vpop.f32.mrf.mxu0 }
 0x114   : > { %v3122_v15 = vpop.f32.mrf.mxu1  ;;  %3356 = vst [vmem:[%s4185_s13 + $0x88] sm:$0xff] %v3324_v45  ;;  %v3327_v47 = vmax.f32 %v3295_v60, 0.0  ;;  %v3052_v20 = vadd.f32 %v3051_v23, %v4160_v31  ;;  %v3296_v10 = vadd.f32 %v4176_v33, %v2912_v22 }
 0x115   : > { %3358 = vst [vmem:[%s4185_s13 + $0x98] sm:$0xff] %v3326_v59  ;;  %v3329_v46 = vmax.f32 %v3297_v19, 0.0  ;;  %v3123_v21 = vadd.f32 %v3122_v15, %v4162_v50  ;;  %v3298_v2 = vadd.f32 %v4176_v33, %v2983_v58  ;;  %v3053_v55 = vpop.f32.mrf.mxu0 }
 0x116   : > { %v3124_v3 = vpop.f32.mrf.mxu1  ;;  %3359 = vst [vmem:[%s4185_s13 + $0xa0] sm:$0xff] %v3327_v47  ;;  %v3299_v42 = vadd.f32 %v4176_v33, %v3052_v20  ;;  %v3054_v63 = vadd.f32 %v3053_v55, %v4164_v32  ;;  %v3328_v50 = vmax.f32 %v3296_v10, 0.0 }
 0x117   : > { %3361 = vst [vmem:[%s4185_s13 + $0xb0] sm:$0xff] %v3329_v46  ;;  %v3301_v8 = vadd.f32 %v4176_v33, %v3123_v21  ;;  %v3125_v31 = vadd.f32 %v3124_v3, %v4166_v52  ;;  %v3330_v0 = vmax.f32 %v3298_v2, 0.0  ;;  %v3193_v16 = vpop.f32.mrf.mxu0 }
 0x118   : > { %v3264_v4 = vpop.f32.mrf.mxu1  ;;  %v3331_v43 = vmax.f32 %v3299_v42, 0.0  ;;  %v3300_v27 = vadd.f32 %v4176_v33, %v3054_v63  ;;  %3360 = vst [vmem:[%s4185_s13 + $0xa8] sm:$0xff] %v3328_v50  ;;  %v3194_v32 = vadd.f32 %v3193_v16, %v4168_v26 }
 0x119   : > { %v3333_v25 = vmax.f32 %v3301_v8, 0.0  ;;  %v3302_v17 = vadd.f32 %v4176_v33, %v3125_v31  ;;  %3362 = vst [vmem:[%s4185_s13 + $0xb8] sm:$0xff] %v3330_v0  ;;  %v3265_v1 = vadd.f32 %v3264_v4, %v4170_v51  ;;  %v3195_v52 = vpop.f32.mrf.mxu0 }
 0x11a   : > { %v3266_v62 = vpop.f32.mrf.mxu1  ;;  %3363 = vst [vmem:[%s4185_s13 + $0xc0] sm:$0xff] %v3331_v43  ;;  %v3332_v36 = vmax.f32 %v3300_v27, 0.0  ;;  %v3196_v34 = vadd.f32 %v3195_v52, %v4172_v29  ;;  %v3303_v49 = vadd.f32 %v4176_v33, %v3194_v32 }
 0x11b   : > { %3365 = vst [vmem:[%s4185_s13 + $0xd0] sm:$0xff] %v3333_v25  ;;  %v3334_v48 = vmax.f32 %v3302_v17, 0.0  ;;  %v3267_v39 = vadd.f32 %v3266_v62, %v4174_v37  ;;  %v3305_v26 = vadd.f32 %v4176_v33, %v3265_v1 }
 0x11c   : > { %3364 = vst [vmem:[%s4185_s13 + $0xc8] sm:$0xff] %v3332_v36  ;;  %v3304_v51 = vadd.f32 %v4176_v33, %v3196_v34  ;;  %v3335_v9 = vmax.f32 %v3303_v49, 0.0 }
 0x11d   : > { %3366 = vst [vmem:[%s4185_s13 + $0xd8] sm:$0xff] %v3334_v48  ;;  %v3306_v6 = vadd.f32 %v4176_v33, %v3267_v39  ;;  %v3337_v7 = vmax.f32 %v3305_v26, 0.0 }
 0x11e   : > { %v3336_v24 = vmax.f32 %v3304_v51, 0.0  ;;  %3367 = vst [vmem:[%s4185_s13 + $0xe0] sm:$0xff] %v3335_v9 }
 0x11f   : > { %v3338_v38 = vmax.f32 %v3306_v6, 0.0  ;;  %3369 = vst [vmem:[%s4185_s13 + $0xf0] sm:$0xff] %v3337_v7 }
 0x120   : > { %3368 = vst [vmem:[%s4185_s13 + $0xe8] sm:$0xff] %v3336_v24 }
 0x121   : > { %3370 = vst [vmem:[%s4185_s13 + $0xf8] sm:$0xff] %v3338_v38 }
 0x122 PF: > { %s15_s20 = sadd.s32 1, %s3573_s20   ;;  %s4286_s18 = smov %s3569_s19 }
 0x123   : > { %p12_p5 = scmp.ge.s32.totalorder %s15_s20, 4   ;;  %s4287_s19 = smov %s4289_s21 }
 0x125   :  { %14 = sbr.rel (!%p12_p5) target bundleno = 2 (0x2), region = 73 }

</bundles_post_ra>
